<compile_context>
chip_gen: v6e
topology: v6e:2x2x1
jax: 0.10.0
libtpu: 0.0.40
codegen_flags: <defaults>
</compile_context>

<pallas_src>
import jax
import jax.numpy as jnp
from jax import lax
from jax.experimental import pallas as pl
from jax.experimental.pallas import tpu as pltpu

NEG_BIG = -1e30  # mask value baked into padded vocab columns of b_out (f32)


def _round_up(x, m):
    return (x + m - 1) // m * m


def decoder_rnn_kernel(ids_ref,                                   # scalar prefetch (SMEM)
                       emb_hbm, h0_ref, w_ih_ref, b_ih_ref,       # inputs
                       w_hh_ref, b_hh_ref, w_out_ref, b_out_ref,
                       logits_ref, hnew_ref, lse_ref,             # outputs
                       emb_buf, dma_sems, m_sc, l_sc):            # scratch
    j = pl.program_id(0)
    n_tiles = pl.num_programs(0)
    Bp, Hp = h0_ref.shape

    # ---------- grid step 0: gather embeddings + single-step GRU ----------
    @pl.when(j == 0)
    def _embed_and_gru():
        # Real row gather: one small DMA per batch row, row index read from
        # the scalar-prefetch SMEM ref.  Table stays in HBM (pl.ANY).
        copies = [
            pltpu.make_async_copy(
                emb_hbm.at[pl.ds(ids_ref[b], 1), :],
                emb_buf.at[pl.ds(b, 1), :],
                dma_sems.at[b])
            for b in range(Bp)
        ]
        for c in copies:
            c.start()
        for c in copies:
            c.wait()

        # Embedding + ReLU (f32), cast to bf16 only for the MXU dots.
        emb = jnp.maximum(emb_buf[...], 0.0)
        emb_bf = emb.astype(jnp.bfloat16)

        # Single-timestep GRU with packed gates (r|z|n blocks along lanes).
        h = h0_ref[...]                                  # f32 (Bp, Hp)
        h_bf = h.astype(jnp.bfloat16)
        gi = jnp.dot(emb_bf, w_ih_ref[...],
                     preferred_element_type=jnp.float32) + b_ih_ref[...]
        gh = jnp.dot(h_bf, w_hh_ref[...],
                     preferred_element_type=jnp.float32) + b_hh_ref[...]
        r = jax.nn.sigmoid(gi[:, :Hp] + gh[:, :Hp])
        z = jax.nn.sigmoid(gi[:, Hp:2 * Hp] + gh[:, Hp:2 * Hp])
        n = jnp.tanh(gi[:, 2 * Hp:] + r * gh[:, 2 * Hp:])
        hnew_ref[...] = (1.0 - z) * n + z * h            # f32, resident across grid

        # Init online log-sum-exp state.
        m_sc[...] = jnp.full_like(m_sc, -jnp.inf)
        l_sc[...] = jnp.zeros_like(l_sc)

    # ---------- every grid step: one streamed vocab tile of the projection ----------
    h_bf = hnew_ref[...].astype(jnp.bfloat16)
    logits = jnp.dot(h_bf, w_out_ref[...],
                     preferred_element_type=jnp.float32) + b_out_ref[...]
    logits_ref[...] = logits

    # Online (max, sum-exp) accumulation; padded columns carry -1e30 bias so
    # exp underflows to exactly 0 (finite, so no -inf - -inf NaN).
    m_prev = m_sc[...]
    m_new = jnp.maximum(m_prev, jnp.max(logits, axis=1, keepdims=True))
    l_sc[...] = (l_sc[...] * jnp.exp(m_prev - m_new)
                 + jnp.sum(jnp.exp(logits - m_new), axis=1, keepdims=True))
    m_sc[...] = m_new

    @pl.when(j == n_tiles - 1)
    def _finalize():
        lse_ref[...] = m_sc[...] + jnp.log(l_sc[...])


def pack_params(params):
    """Pad/pack unpadded params into lane-dense, (8,128)-aligned kernel tensors."""
    V, H = params["embedding"].shape
    Hp = _round_up(H, 128)
    Vp = _round_up(V, 128)
    # Largest lane tile (<=512, multiple of 128) that divides Vp.
    tile_v = 512 if Vp % 512 == 0 else (256 if Vp % 256 == 0 else 128)

    def pad2(x, rows, cols, value=0.0):
        r, c = x.shape
        return jnp.pad(x, ((0, rows - r), (0, cols - c)), constant_values=value)

    def pack_gates(w, rows_p, dtype):
        # (R, 3H), gate blocks of width H -> (rows_p, 3*Hp), gate blocks of width Hp.
        return jnp.concatenate(
            [pad2(w[:, g * H:(g + 1) * H], rows_p, Hp) for g in range(3)],
            axis=1).astype(dtype)

    return dict(
        V=V, H=H, Vp=Vp, Hp=Hp, TILE_V=tile_v,
        # table stays f32: only B rows are gathered, bytes are negligible.
        embedding=pad2(params["embedding"], Vp, Hp).astype(jnp.float32),
        w_ih=pack_gates(params["w_ih"], Hp, jnp.bfloat16),
        b_ih=pack_gates(params["b_ih"], 1, jnp.float32),
        w_hh=pack_gates(params["w_hh"], Hp, jnp.bfloat16),
        b_hh=pack_gates(params["b_hh"], 1, jnp.float32),
        w_out=pad2(params["w_out"], Hp, Vp).astype(jnp.bfloat16),
        b_out=jnp.pad(params["b_out"].astype(jnp.float32),
                      ((0, 0), (0, Vp - V)), constant_values=NEG_BIG),
    )


def decoder_rnn_forward(packed, input_ids, hidden):
    """input_ids: (B,) int tokens, hidden: (1, B, H).
    Returns (log_probs (B, V), new_hidden (1, B, H)) matching DecoderRNN.forward."""
    V, H, Vp, Hp, TILE_V = (packed[k] for k in ("V", "H", "Vp", "Hp", "TILE_V"))
    B = input_ids.shape[0]
    Bp = _round_up(B, 8)
    num_v_tiles = Vp // TILE_V

    # Clamp ids so an out-of-range token can never become an OOB HBM DMA;
    # padded batch rows reuse id 0 (the padding_idx=0 zero embedding row).
    ids = jnp.clip(input_ids.astype(jnp.int32), 0, V - 1)
    ids = jnp.pad(ids, (0, Bp - B))
    h0 = jnp.pad(hidden[0].astype(jnp.float32), ((0, Bp - B), (0, Hp - H)))

    # VMEM budget: resident recurrent weights + double-buffered streamed tiles.
    resident = (2 * Hp * 3 * Hp * 2        # w_ih, w_hh (bf16)
                + 2 * 3 * Hp * 4           # b_ih, b_hh (f32)
                + 3 * Bp * Hp * 4          # h0, h_new, emb_buf (f32)
                + 3 * Bp * 4)              # m, l, lse
    streamed = (Hp * TILE_V * 2            # w_out tile (bf16)
                + TILE_V * 4               # b_out tile (f32)
                + Bp * TILE_V * 4)         # logits tile (f32)
    vmem_limit = min(2 * (resident + 2 * streamed) + (2 << 20), 64 << 20)

    grid_spec = pltpu.PrefetchScalarGridSpec(
        num_scalar_prefetch=1,
        grid=(num_v_tiles,),
        in_specs=[
            pl.BlockSpec(memory_space=pl.ANY),                        # embedding table (HBM)
            pl.BlockSpec((Bp, Hp), lambda j, _ids: (0, 0)),           # h0
            pl.BlockSpec((Hp, 3 * Hp), lambda j, _ids: (0, 0)),       # w_ih
            pl.BlockSpec((1, 3 * Hp), lambda j, _ids: (0, 0)),        # b_ih
            pl.BlockSpec((Hp, 3 * Hp), lambda j, _ids: (0, 0)),       # w_hh
            pl.BlockSpec((1, 3 * Hp), lambda j, _ids: (0, 0)),        # b_hh
            pl.BlockSpec((Hp, TILE_V), lambda j, _ids: (0, j)),       # w_out tile
            pl.BlockSpec((1, TILE_V), lambda j, _ids: (0, j)),        # b_out tile
        ],
        out_specs=(
            pl.BlockSpec((Bp, TILE_V), lambda j, _ids: (0, j)),       # raw logits
            pl.BlockSpec((Bp, Hp), lambda j, _ids: (0, 0)),           # h_new
            pl.BlockSpec((Bp, 1), lambda j, _ids: (0, 0)),            # lse
        ),
        scratch_shapes=[
            pltpu.VMEM((Bp, Hp), jnp.float32),     # gathered embedding rows
            pltpu.SemaphoreType.DMA((Bp,)),        # one DMA sem per gathered row
            pltpu.VMEM((Bp, 1), jnp.float32),      # running max
            pltpu.VMEM((Bp, 1), jnp.float32),      # running sum-exp
        ],
    )

    logits, h_new, lse = pl.pallas_call(
        decoder_rnn_kernel,
        out_shape=(
            jax.ShapeDtypeStruct((Bp, Vp), jnp.float32),
            jax.ShapeDtypeStruct((Bp, Hp), jnp.float32),
            jax.ShapeDtypeStruct((Bp, 1), jnp.float32),
        ),
        grid_spec=grid_spec,
        compiler_params=pltpu.CompilerParams(
            dimension_semantics=("arbitrary",),    # vocab axis carries lse/h state
            vmem_limit_bytes=int(vmem_limit),
        ),
    )(ids, packed["embedding"], h0,
      packed["w_ih"], packed["b_ih"], packed["w_hh"], packed["b_hh"],
      packed["w_out"], packed["b_out"])

    logp = logits - lse                         # final log-softmax subtraction
    return logp[:B, :V], h_new[:B, :H][None]


def init_params(key, vocab, H):
    """Unpadded f32 params in JAX layout (weights pre-transposed for x @ W)."""
    ks = jax.random.split(key, 7)

    def u(k, shape, scale):
        return jax.random.uniform(k, shape, jnp.float32, minval=-scale, maxval=scale)

    sh = 1.0 / H ** 0.5
    emb = u(ks[0], (vocab, H), 0.5).at[0].set(0.0)     # padding_idx=0 -> zero row
    return dict(
        embedding=emb,
        w_ih=u(ks[1], (H, 3 * H), sh), b_ih=u(ks[2], (1, 3 * H), sh),
        w_hh=u(ks[3], (H, 3 * H), sh), b_hh=u(ks[4], (1, 3 * H), sh),
        w_out=u(ks[5], (H, vocab), sh), b_out=u(ks[6], (1, vocab), sh),
    )


def reference_forward(params, input_ids, hidden):
    """Pure-JAX f32 reference reproducing the PyTorch DecoderRNN forward."""
    H = hidden.shape[-1]
    emb = jax.nn.relu(params["embedding"][input_ids])      # Embedding + ReLU
    h = hidden[0]
    gi = emb @ params["w_ih"] + params["b_ih"]
    gh = h @ params["w_hh"] + params["b_hh"]
    r = jax.nn.sigmoid(gi[:, :H] + gh[:, :H])
    z = jax.nn.sigmoid(gi[:, H:2 * H] + gh[:, H:2 * H])
    n = jnp.tanh(gi[:, 2 * H:] + r * gh[:, 2 * H:])
    h_new = (1.0 - z) * n + z * h
    logits = h_new @ params["w_out"] + params["b_out"]
    logp = jax.nn.log_softmax(logits, axis=1)
    return logp, h_new[None]


if __name__ == "__main__":
    B, H, V = 4, 32, 16            # batch, hidden_size, output_size (vocab)
    key = jax.random.PRNGKey(0)
    k_params, k_in, k_h = jax.random.split(key, 3)

    params = init_params(k_params, V, H)
    packed = pack_params(params)
    input_ids = jax.random.randint(k_in, (B,), 0, V, dtype=jnp.int32)
    hidden = jax.random.normal(k_h, (1, B, H), jnp.float32)

    logp, h_new = decoder_rnn_forward(packed, input_ids, hidden)
    jax.block_until_ready((logp, h_new))

    ref_logp, ref_hnew = reference_forward(params, input_ids, hidden)
    assert logp.shape == ref_logp.shape, (logp.shape, ref_logp.shape)
    assert h_new.shape == ref_hnew.shape, (h_new.shape, ref_hnew.shape)
    # Weights/activations go through bf16 at the dots -> bf16-sized tolerance.
    assert jnp.allclose(logp, ref_logp, atol=5e-2, rtol=5e-2), \
        float(jnp.max(jnp.abs(logp - ref_logp)))
    assert jnp.allclose(h_new, ref_hnew, atol=5e-2, rtol=5e-2), \
        float(jnp.max(jnp.abs(h_new - ref_hnew)))

    print("KERNEL_OK")
</pallas_src>

<mosaic_0001>
module attributes {stable_mosaic.version = 11 : i64} {
  func.func @decoder_rnn_kernel(%arg0: i32, %arg1: memref<8xi32, #tpu.memory_space<smem>>, %arg2: memref<128x128xf32, #tpu.memory_space<any>>, %arg3: memref<8x128xf32, #tpu.memory_space<vmem>>, %arg4: memref<128x384xbf16, #tpu.memory_space<vmem>>, %arg5: memref<1x384xf32, #tpu.memory_space<vmem>>, %arg6: memref<128x384xbf16, #tpu.memory_space<vmem>>, %arg7: memref<1x384xf32, #tpu.memory_space<vmem>>, %arg8: memref<128x128xbf16, #tpu.memory_space<vmem>>, %arg9: memref<1x128xf32, #tpu.memory_space<vmem>>, %arg10: memref<8x128xf32, #tpu.memory_space<vmem>>, %arg11: memref<8x128xf32, #tpu.memory_space<vmem>>, %arg12: memref<8x1xf32, #tpu.memory_space<vmem>>, %arg13: memref<8x128xf32, #tpu.memory_space<vmem>>, %arg14: memref<8x!tpu.dma_semaphore, #tpu.memory_space<semaphore_mem>>, %arg15: memref<8x1xf32, #tpu.memory_space<vmem>>, %arg16: memref<8x1xf32, #tpu.memory_space<vmem>>) attributes {dimension_semantics = [#tpu.dimension_semantics<arbitrary>], iteration_bounds = array<i64: 1>, scalar_prefetch = 1 : i64, scratch_operands = 4 : i64, tpu.core_type = #tpu.core_type<tc>, window_params = [{}, {pipeline_mode = #tpu.pipeline_mode<synchronous>, transform_indices = @transform_1, window_bounds = array<i64: 8, 128>}, {pipeline_mode = #tpu.pipeline_mode<synchronous>, transform_indices = @transform_2, window_bounds = array<i64: 128, 384>}, {pipeline_mode = #tpu.pipeline_mode<synchronous>, transform_indices = @transform_3, window_bounds = array<i64: 1, 384>}, {pipeline_mode = #tpu.pipeline_mode<synchronous>, transform_indices = @transform_4, window_bounds = array<i64: 128, 384>}, {pipeline_mode = #tpu.pipeline_mode<synchronous>, transform_indices = @transform_5, window_bounds = array<i64: 1, 384>}, {transform_indices = @transform_6, window_bounds = array<i64: 128, 128>}, {transform_indices = @transform_7, window_bounds = array<i64: 1, 128>}, {transform_indices = @transform_8, window_bounds = array<i64: 8, 128>}, {pipeline_mode = #tpu.pipeline_mode<synchronous>, transform_indices = @transform_9, window_bounds = array<i64: 8, 128>}, {pipeline_mode = #tpu.pipeline_mode<synchronous>, transform_indices = @transform_10, window_bounds = array<i64: 8, 1>}]} {
    %c0_i32 = arith.constant 0 : i32
    %0 = arith.cmpi eq, %arg0, %c0_i32 : i32
    %1 = arith.extui %0 : i1 to i32
    %c0_i32_0 = arith.constant 0 : i32
    %2 = arith.cmpi ne, %1, %c0_i32_0 : i32
    scf.if %2 {
      %c0_20 = arith.constant 0 : index
      %30 = memref.load %arg1[%c0_20] : memref<8xi32, #tpu.memory_space<smem>>
      %c1 = arith.constant 1 : index
      %31 = memref.load %arg1[%c1] : memref<8xi32, #tpu.memory_space<smem>>
      %c2 = arith.constant 2 : index
      %32 = memref.load %arg1[%c2] : memref<8xi32, #tpu.memory_space<smem>>
      %c3 = arith.constant 3 : index
      %33 = memref.load %arg1[%c3] : memref<8xi32, #tpu.memory_space<smem>>
      %c4 = arith.constant 4 : index
      %34 = memref.load %arg1[%c4] : memref<8xi32, #tpu.memory_space<smem>>
      %c5 = arith.constant 5 : index
      %35 = memref.load %arg1[%c5] : memref<8xi32, #tpu.memory_space<smem>>
      %c6 = arith.constant 6 : index
      %36 = memref.load %arg1[%c6] : memref<8xi32, #tpu.memory_space<smem>>
      %c7 = arith.constant 7 : index
      %37 = memref.load %arg1[%c7] : memref<8xi32, #tpu.memory_space<smem>>
      %c0_i32_21 = arith.constant 0 : i32
      %c0_i32_22 = arith.constant 0 : i32
      %38 = tpu.memref_slice %arg2[%30, %c0_i32_22] : memref<128x128xf32, #tpu.memory_space<any>> -> memref<1x128xf32, #tpu.memory_space<any>>
      %c0_i32_23 = arith.constant 0 : i32
      %c0_i32_24 = arith.constant 0 : i32
      %39 = tpu.memref_slice %arg13[%c0_i32_23, %c0_i32_24] : memref<8x128xf32, #tpu.memory_space<vmem>> -> memref<1x128xf32, #tpu.memory_space<vmem>>
      %40 = tpu.memref_slice %arg14[%c0_i32_21] : memref<8x!tpu.dma_semaphore, #tpu.memory_space<semaphore_mem>> -> memref<1x!tpu.dma_semaphore, #tpu.memory_space<semaphore_mem>>
      %41 = tpu.memref_squeeze %40 : memref<1x!tpu.dma_semaphore, #tpu.memory_space<semaphore_mem>> -> memref<!tpu.dma_semaphore, #tpu.memory_space<semaphore_mem>>
      tpu.enqueue_dma source(%38 : memref<1x128xf32, #tpu.memory_space<any>>) target(%39 : memref<1x128xf32, #tpu.memory_space<vmem>>) target_semaphore(%41 : memref<!tpu.dma_semaphore, #tpu.memory_space<semaphore_mem>>)
      %c1_i32 = arith.constant 1 : i32
      %c0_i32_25 = arith.constant 0 : i32
      %42 = tpu.memref_slice %arg2[%31, %c0_i32_25] : memref<128x128xf32, #tpu.memory_space<any>> -> memref<1x128xf32, #tpu.memory_space<any>>
      %c1_i32_26 = arith.constant 1 : i32
      %c0_i32_27 = arith.constant 0 : i32
      %43 = tpu.memref_slice %arg13[%c1_i32_26, %c0_i32_27] : memref<8x128xf32, #tpu.memory_space<vmem>> -> memref<1x128xf32, #tpu.memory_space<vmem>>
      %44 = tpu.memref_slice %arg14[%c1_i32] : memref<8x!tpu.dma_semaphore, #tpu.memory_space<semaphore_mem>> -> memref<1x!tpu.dma_semaphore, #tpu.memory_space<semaphore_mem>>
      %45 = tpu.memref_squeeze %44 : memref<1x!tpu.dma_semaphore, #tpu.memory_space<semaphore_mem>> -> memref<!tpu.dma_semaphore, #tpu.memory_space<semaphore_mem>>
      tpu.enqueue_dma source(%42 : memref<1x128xf32, #tpu.memory_space<any>>) target(%43 : memref<1x128xf32, #tpu.memory_space<vmem>>) target_semaphore(%45 : memref<!tpu.dma_semaphore, #tpu.memory_space<semaphore_mem>>)
      %c2_i32 = arith.constant 2 : i32
      %c0_i32_28 = arith.constant 0 : i32
      %46 = tpu.memref_slice %arg2[%32, %c0_i32_28] : memref<128x128xf32, #tpu.memory_space<any>> -> memref<1x128xf32, #tpu.memory_space<any>>
      %c2_i32_29 = arith.constant 2 : i32
      %c0_i32_30 = arith.constant 0 : i32
      %47 = tpu.memref_slice %arg13[%c2_i32_29, %c0_i32_30] : memref<8x128xf32, #tpu.memory_space<vmem>> -> memref<1x128xf32, #tpu.memory_space<vmem>>
      %48 = tpu.memref_slice %arg14[%c2_i32] : memref<8x!tpu.dma_semaphore, #tpu.memory_space<semaphore_mem>> -> memref<1x!tpu.dma_semaphore, #tpu.memory_space<semaphore_mem>>
      %49 = tpu.memref_squeeze %48 : memref<1x!tpu.dma_semaphore, #tpu.memory_space<semaphore_mem>> -> memref<!tpu.dma_semaphore, #tpu.memory_space<semaphore_mem>>
      tpu.enqueue_dma source(%46 : memref<1x128xf32, #tpu.memory_space<any>>) target(%47 : memref<1x128xf32, #tpu.memory_space<vmem>>) target_semaphore(%49 : memref<!tpu.dma_semaphore, #tpu.memory_space<semaphore_mem>>)
      %c3_i32 = arith.constant 3 : i32
      %c0_i32_31 = arith.constant 0 : i32
      %50 = tpu.memref_slice %arg2[%33, %c0_i32_31] : memref<128x128xf32, #tpu.memory_space<any>> -> memref<1x128xf32, #tpu.memory_space<any>>
      %c3_i32_32 = arith.constant 3 : i32
      %c0_i32_33 = arith.constant 0 : i32
      %51 = tpu.memref_slice %arg13[%c3_i32_32, %c0_i32_33] : memref<8x128xf32, #tpu.memory_space<vmem>> -> memref<1x128xf32, #tpu.memory_space<vmem>>
      %52 = tpu.memref_slice %arg14[%c3_i32] : memref<8x!tpu.dma_semaphore, #tpu.memory_space<semaphore_mem>> -> memref<1x!tpu.dma_semaphore, #tpu.memory_space<semaphore_mem>>
      %53 = tpu.memref_squeeze %52 : memref<1x!tpu.dma_semaphore, #tpu.memory_space<semaphore_mem>> -> memref<!tpu.dma_semaphore, #tpu.memory_space<semaphore_mem>>
      tpu.enqueue_dma source(%50 : memref<1x128xf32, #tpu.memory_space<any>>) target(%51 : memref<1x128xf32, #tpu.memory_space<vmem>>) target_semaphore(%53 : memref<!tpu.dma_semaphore, #tpu.memory_space<semaphore_mem>>)
      %c4_i32 = arith.constant 4 : i32
      %c0_i32_34 = arith.constant 0 : i32
      %54 = tpu.memref_slice %arg2[%34, %c0_i32_34] : memref<128x128xf32, #tpu.memory_space<any>> -> memref<1x128xf32, #tpu.memory_space<any>>
      %c4_i32_35 = arith.constant 4 : i32
      %c0_i32_36 = arith.constant 0 : i32
      %55 = tpu.memref_slice %arg13[%c4_i32_35, %c0_i32_36] : memref<8x128xf32, #tpu.memory_space<vmem>> -> memref<1x128xf32, #tpu.memory_space<vmem>>
      %56 = tpu.memref_slice %arg14[%c4_i32] : memref<8x!tpu.dma_semaphore, #tpu.memory_space<semaphore_mem>> -> memref<1x!tpu.dma_semaphore, #tpu.memory_space<semaphore_mem>>
      %57 = tpu.memref_squeeze %56 : memref<1x!tpu.dma_semaphore, #tpu.memory_space<semaphore_mem>> -> memref<!tpu.dma_semaphore, #tpu.memory_space<semaphore_mem>>
      tpu.enqueue_dma source(%54 : memref<1x128xf32, #tpu.memory_space<any>>) target(%55 : memref<1x128xf32, #tpu.memory_space<vmem>>) target_semaphore(%57 : memref<!tpu.dma_semaphore, #tpu.memory_space<semaphore_mem>>)
      %c5_i32 = arith.constant 5 : i32
      %c0_i32_37 = arith.constant 0 : i32
      %58 = tpu.memref_slice %arg2[%35, %c0_i32_37] : memref<128x128xf32, #tpu.memory_space<any>> -> memref<1x128xf32, #tpu.memory_space<any>>
      %c5_i32_38 = arith.constant 5 : i32
      %c0_i32_39 = arith.constant 0 : i32
      %59 = tpu.memref_slice %arg13[%c5_i32_38, %c0_i32_39] : memref<8x128xf32, #tpu.memory_space<vmem>> -> memref<1x128xf32, #tpu.memory_space<vmem>>
      %60 = tpu.memref_slice %arg14[%c5_i32] : memref<8x!tpu.dma_semaphore, #tpu.memory_space<semaphore_mem>> -> memref<1x!tpu.dma_semaphore, #tpu.memory_space<semaphore_mem>>
      %61 = tpu.memref_squeeze %60 : memref<1x!tpu.dma_semaphore, #tpu.memory_space<semaphore_mem>> -> memref<!tpu.dma_semaphore, #tpu.memory_space<semaphore_mem>>
      tpu.enqueue_dma source(%58 : memref<1x128xf32, #tpu.memory_space<any>>) target(%59 : memref<1x128xf32, #tpu.memory_space<vmem>>) target_semaphore(%61 : memref<!tpu.dma_semaphore, #tpu.memory_space<semaphore_mem>>)
      %c6_i32 = arith.constant 6 : i32
      %c0_i32_40 = arith.constant 0 : i32
      %62 = tpu.memref_slice %arg2[%36, %c0_i32_40] : memref<128x128xf32, #tpu.memory_space<any>> -> memref<1x128xf32, #tpu.memory_space<any>>
      %c6_i32_41 = arith.constant 6 : i32
      %c0_i32_42 = arith.constant 0 : i32
      %63 = tpu.memref_slice %arg13[%c6_i32_41, %c0_i32_42] : memref<8x128xf32, #tpu.memory_space<vmem>> -> memref<1x128xf32, #tpu.memory_space<vmem>>
      %64 = tpu.memref_slice %arg14[%c6_i32] : memref<8x!tpu.dma_semaphore, #tpu.memory_space<semaphore_mem>> -> memref<1x!tpu.dma_semaphore, #tpu.memory_space<semaphore_mem>>
      %65 = tpu.memref_squeeze %64 : memref<1x!tpu.dma_semaphore, #tpu.memory_space<semaphore_mem>> -> memref<!tpu.dma_semaphore, #tpu.memory_space<semaphore_mem>>
      tpu.enqueue_dma source(%62 : memref<1x128xf32, #tpu.memory_space<any>>) target(%63 : memref<1x128xf32, #tpu.memory_space<vmem>>) target_semaphore(%65 : memref<!tpu.dma_semaphore, #tpu.memory_space<semaphore_mem>>)
      %c7_i32 = arith.constant 7 : i32
      %c0_i32_43 = arith.constant 0 : i32
      %66 = tpu.memref_slice %arg2[%37, %c0_i32_43] : memref<128x128xf32, #tpu.memory_space<any>> -> memref<1x128xf32, #tpu.memory_space<any>>
      %c7_i32_44 = arith.constant 7 : i32
      %c0_i32_45 = arith.constant 0 : i32
      %67 = tpu.memref_slice %arg13[%c7_i32_44, %c0_i32_45] : memref<8x128xf32, #tpu.memory_space<vmem>> -> memref<1x128xf32, #tpu.memory_space<vmem>>
      %68 = tpu.memref_slice %arg14[%c7_i32] : memref<8x!tpu.dma_semaphore, #tpu.memory_space<semaphore_mem>> -> memref<1x!tpu.dma_semaphore, #tpu.memory_space<semaphore_mem>>
      %69 = tpu.memref_squeeze %68 : memref<1x!tpu.dma_semaphore, #tpu.memory_space<semaphore_mem>> -> memref<!tpu.dma_semaphore, #tpu.memory_space<semaphore_mem>>
      tpu.enqueue_dma source(%66 : memref<1x128xf32, #tpu.memory_space<any>>) target(%67 : memref<1x128xf32, #tpu.memory_space<vmem>>) target_semaphore(%69 : memref<!tpu.dma_semaphore, #tpu.memory_space<semaphore_mem>>)
      %c0_i32_46 = arith.constant 0 : i32
      %c0_i32_47 = arith.constant 0 : i32
      %70 = tpu.memref_slice %arg2[%30, %c0_i32_47] : memref<128x128xf32, #tpu.memory_space<any>> -> memref<1x128xf32, #tpu.memory_space<any>>
      %c0_i32_48 = arith.constant 0 : i32
      %c0_i32_49 = arith.constant 0 : i32
      %71 = tpu.memref_slice %arg13[%c0_i32_48, %c0_i32_49] : memref<8x128xf32, #tpu.memory_space<vmem>> -> memref<1x128xf32, #tpu.memory_space<vmem>>
      %72 = tpu.memref_slice %arg14[%c0_i32_46] : memref<8x!tpu.dma_semaphore, #tpu.memory_space<semaphore_mem>> -> memref<1x!tpu.dma_semaphore, #tpu.memory_space<semaphore_mem>>
      %73 = tpu.memref_squeeze %72 : memref<1x!tpu.dma_semaphore, #tpu.memory_space<semaphore_mem>> -> memref<!tpu.dma_semaphore, #tpu.memory_space<semaphore_mem>>
      tpu.wait_dma2 semaphore(%73 : memref<!tpu.dma_semaphore, #tpu.memory_space<semaphore_mem>>) src(%70 : memref<1x128xf32, #tpu.memory_space<any>>) dst(%71 : memref<1x128xf32, #tpu.memory_space<vmem>>)
      %c1_i32_50 = arith.constant 1 : i32
      %c0_i32_51 = arith.constant 0 : i32
      %74 = tpu.memref_slice %arg2[%31, %c0_i32_51] : memref<128x128xf32, #tpu.memory_space<any>> -> memref<1x128xf32, #tpu.memory_space<any>>
      %c1_i32_52 = arith.constant 1 : i32
      %c0_i32_53 = arith.constant 0 : i32
      %75 = tpu.memref_slice %arg13[%c1_i32_52, %c0_i32_53] : memref<8x128xf32, #tpu.memory_space<vmem>> -> memref<1x128xf32, #tpu.memory_space<vmem>>
      %76 = tpu.memref_slice %arg14[%c1_i32_50] : memref<8x!tpu.dma_semaphore, #tpu.memory_space<semaphore_mem>> -> memref<1x!tpu.dma_semaphore, #tpu.memory_space<semaphore_mem>>
      %77 = tpu.memref_squeeze %76 : memref<1x!tpu.dma_semaphore, #tpu.memory_space<semaphore_mem>> -> memref<!tpu.dma_semaphore, #tpu.memory_space<semaphore_mem>>
      tpu.wait_dma2 semaphore(%77 : memref<!tpu.dma_semaphore, #tpu.memory_space<semaphore_mem>>) src(%74 : memref<1x128xf32, #tpu.memory_space<any>>) dst(%75 : memref<1x128xf32, #tpu.memory_space<vmem>>)
      %c2_i32_54 = arith.constant 2 : i32
      %c0_i32_55 = arith.constant 0 : i32
      %78 = tpu.memref_slice %arg2[%32, %c0_i32_55] : memref<128x128xf32, #tpu.memory_space<any>> -> memref<1x128xf32, #tpu.memory_space<any>>
      %c2_i32_56 = arith.constant 2 : i32
      %c0_i32_57 = arith.constant 0 : i32
      %79 = tpu.memref_slice %arg13[%c2_i32_56, %c0_i32_57] : memref<8x128xf32, #tpu.memory_space<vmem>> -> memref<1x128xf32, #tpu.memory_space<vmem>>
      %80 = tpu.memref_slice %arg14[%c2_i32_54] : memref<8x!tpu.dma_semaphore, #tpu.memory_space<semaphore_mem>> -> memref<1x!tpu.dma_semaphore, #tpu.memory_space<semaphore_mem>>
      %81 = tpu.memref_squeeze %80 : memref<1x!tpu.dma_semaphore, #tpu.memory_space<semaphore_mem>> -> memref<!tpu.dma_semaphore, #tpu.memory_space<semaphore_mem>>
      tpu.wait_dma2 semaphore(%81 : memref<!tpu.dma_semaphore, #tpu.memory_space<semaphore_mem>>) src(%78 : memref<1x128xf32, #tpu.memory_space<any>>) dst(%79 : memref<1x128xf32, #tpu.memory_space<vmem>>)
      %c3_i32_58 = arith.constant 3 : i32
      %c0_i32_59 = arith.constant 0 : i32
      %82 = tpu.memref_slice %arg2[%33, %c0_i32_59] : memref<128x128xf32, #tpu.memory_space<any>> -> memref<1x128xf32, #tpu.memory_space<any>>
      %c3_i32_60 = arith.constant 3 : i32
      %c0_i32_61 = arith.constant 0 : i32
      %83 = tpu.memref_slice %arg13[%c3_i32_60, %c0_i32_61] : memref<8x128xf32, #tpu.memory_space<vmem>> -> memref<1x128xf32, #tpu.memory_space<vmem>>
      %84 = tpu.memref_slice %arg14[%c3_i32_58] : memref<8x!tpu.dma_semaphore, #tpu.memory_space<semaphore_mem>> -> memref<1x!tpu.dma_semaphore, #tpu.memory_space<semaphore_mem>>
      %85 = tpu.memref_squeeze %84 : memref<1x!tpu.dma_semaphore, #tpu.memory_space<semaphore_mem>> -> memref<!tpu.dma_semaphore, #tpu.memory_space<semaphore_mem>>
      tpu.wait_dma2 semaphore(%85 : memref<!tpu.dma_semaphore, #tpu.memory_space<semaphore_mem>>) src(%82 : memref<1x128xf32, #tpu.memory_space<any>>) dst(%83 : memref<1x128xf32, #tpu.memory_space<vmem>>)
      %c4_i32_62 = arith.constant 4 : i32
      %c0_i32_63 = arith.constant 0 : i32
      %86 = tpu.memref_slice %arg2[%34, %c0_i32_63] : memref<128x128xf32, #tpu.memory_space<any>> -> memref<1x128xf32, #tpu.memory_space<any>>
      %c4_i32_64 = arith.constant 4 : i32
      %c0_i32_65 = arith.constant 0 : i32
      %87 = tpu.memref_slice %arg13[%c4_i32_64, %c0_i32_65] : memref<8x128xf32, #tpu.memory_space<vmem>> -> memref<1x128xf32, #tpu.memory_space<vmem>>
      %88 = tpu.memref_slice %arg14[%c4_i32_62] : memref<8x!tpu.dma_semaphore, #tpu.memory_space<semaphore_mem>> -> memref<1x!tpu.dma_semaphore, #tpu.memory_space<semaphore_mem>>
      %89 = tpu.memref_squeeze %88 : memref<1x!tpu.dma_semaphore, #tpu.memory_space<semaphore_mem>> -> memref<!tpu.dma_semaphore, #tpu.memory_space<semaphore_mem>>
      tpu.wait_dma2 semaphore(%89 : memref<!tpu.dma_semaphore, #tpu.memory_space<semaphore_mem>>) src(%86 : memref<1x128xf32, #tpu.memory_space<any>>) dst(%87 : memref<1x128xf32, #tpu.memory_space<vmem>>)
      %c5_i32_66 = arith.constant 5 : i32
      %c0_i32_67 = arith.constant 0 : i32
      %90 = tpu.memref_slice %arg2[%35, %c0_i32_67] : memref<128x128xf32, #tpu.memory_space<any>> -> memref<1x128xf32, #tpu.memory_space<any>>
      %c5_i32_68 = arith.constant 5 : i32
      %c0_i32_69 = arith.constant 0 : i32
      %91 = tpu.memref_slice %arg13[%c5_i32_68, %c0_i32_69] : memref<8x128xf32, #tpu.memory_space<vmem>> -> memref<1x128xf32, #tpu.memory_space<vmem>>
      %92 = tpu.memref_slice %arg14[%c5_i32_66] : memref<8x!tpu.dma_semaphore, #tpu.memory_space<semaphore_mem>> -> memref<1x!tpu.dma_semaphore, #tpu.memory_space<semaphore_mem>>
      %93 = tpu.memref_squeeze %92 : memref<1x!tpu.dma_semaphore, #tpu.memory_space<semaphore_mem>> -> memref<!tpu.dma_semaphore, #tpu.memory_space<semaphore_mem>>
      tpu.wait_dma2 semaphore(%93 : memref<!tpu.dma_semaphore, #tpu.memory_space<semaphore_mem>>) src(%90 : memref<1x128xf32, #tpu.memory_space<any>>) dst(%91 : memref<1x128xf32, #tpu.memory_space<vmem>>)
      %c6_i32_70 = arith.constant 6 : i32
      %c0_i32_71 = arith.constant 0 : i32
      %94 = tpu.memref_slice %arg2[%36, %c0_i32_71] : memref<128x128xf32, #tpu.memory_space<any>> -> memref<1x128xf32, #tpu.memory_space<any>>
      %c6_i32_72 = arith.constant 6 : i32
      %c0_i32_73 = arith.constant 0 : i32
      %95 = tpu.memref_slice %arg13[%c6_i32_72, %c0_i32_73] : memref<8x128xf32, #tpu.memory_space<vmem>> -> memref<1x128xf32, #tpu.memory_space<vmem>>
      %96 = tpu.memref_slice %arg14[%c6_i32_70] : memref<8x!tpu.dma_semaphore, #tpu.memory_space<semaphore_mem>> -> memref<1x!tpu.dma_semaphore, #tpu.memory_space<semaphore_mem>>
      %97 = tpu.memref_squeeze %96 : memref<1x!tpu.dma_semaphore, #tpu.memory_space<semaphore_mem>> -> memref<!tpu.dma_semaphore, #tpu.memory_space<semaphore_mem>>
      tpu.wait_dma2 semaphore(%97 : memref<!tpu.dma_semaphore, #tpu.memory_space<semaphore_mem>>) src(%94 : memref<1x128xf32, #tpu.memory_space<any>>) dst(%95 : memref<1x128xf32, #tpu.memory_space<vmem>>)
      %c7_i32_74 = arith.constant 7 : i32
      %c0_i32_75 = arith.constant 0 : i32
      %98 = tpu.memref_slice %arg2[%37, %c0_i32_75] : memref<128x128xf32, #tpu.memory_space<any>> -> memref<1x128xf32, #tpu.memory_space<any>>
      %c7_i32_76 = arith.constant 7 : i32
      %c0_i32_77 = arith.constant 0 : i32
      %99 = tpu.memref_slice %arg13[%c7_i32_76, %c0_i32_77] : memref<8x128xf32, #tpu.memory_space<vmem>> -> memref<1x128xf32, #tpu.memory_space<vmem>>
      %100 = tpu.memref_slice %arg14[%c7_i32_74] : memref<8x!tpu.dma_semaphore, #tpu.memory_space<semaphore_mem>> -> memref<1x!tpu.dma_semaphore, #tpu.memory_space<semaphore_mem>>
      %101 = tpu.memref_squeeze %100 : memref<1x!tpu.dma_semaphore, #tpu.memory_space<semaphore_mem>> -> memref<!tpu.dma_semaphore, #tpu.memory_space<semaphore_mem>>
      tpu.wait_dma2 semaphore(%101 : memref<!tpu.dma_semaphore, #tpu.memory_space<semaphore_mem>>) src(%98 : memref<1x128xf32, #tpu.memory_space<any>>) dst(%99 : memref<1x128xf32, #tpu.memory_space<vmem>>)
      %c0_78 = arith.constant 0 : index
      %c0_79 = arith.constant 0 : index
      %102 = vector.load %arg13[%c0_78, %c0_79] : memref<8x128xf32, #tpu.memory_space<vmem>>, vector<8x128xf32>
      %cst_80 = arith.constant 0.000000e+00 : f32
      %103 = vector.broadcast %cst_80 : f32 to vector<8x128xf32>
      %104 = arith.maximumf %102, %103 : vector<8x128xf32>
      %105 = arith.truncf %104 : vector<8x128xf32> to vector<8x128xbf16>
      %c0_81 = arith.constant 0 : index
      %c0_82 = arith.constant 0 : index
      %106 = vector.load %arg3[%c0_81, %c0_82] : memref<8x128xf32, #tpu.memory_space<vmem>>, vector<8x128xf32>
      %107 = arith.truncf %106 : vector<8x128xf32> to vector<8x128xbf16>
      %c0_83 = arith.constant 0 : index
      %c0_84 = arith.constant 0 : index
      %108 = vector.load %arg4[%c0_83, %c0_84] : memref<128x384xbf16, #tpu.memory_space<vmem>>, vector<128x384xbf16>
      %cst_85 = arith.constant dense<0.000000e+00> : vector<8x384xf32>
      %109 = tpu.matmul %105, %108, %cst_85 {dimension_numbers = #tpu.dot_dimension_numbers<[1], [0], [0], [1], [0, 0, 1, 1], [], []>} : vector<8x128xbf16>, vector<128x384xbf16>, vector<8x384xf32> -> vector<8x384xf32>
      %c0_86 = arith.constant 0 : index
      %c0_87 = arith.constant 0 : index
      %110 = vector.load %arg5[%c0_86, %c0_87] : memref<1x384xf32, #tpu.memory_space<vmem>>, vector<1x384xf32>
      %111 = vector.broadcast %110 : vector<1x384xf32> to vector<8x384xf32>
      %112 = arith.addf %109, %111 : vector<8x384xf32>
      %c0_88 = arith.constant 0 : index
      %c0_89 = arith.constant 0 : index
      %113 = vector.load %arg6[%c0_88, %c0_89] : memref<128x384xbf16, #tpu.memory_space<vmem>>, vector<128x384xbf16>
      %cst_90 = arith.constant dense<0.000000e+00> : vector<8x384xf32>
      %114 = tpu.matmul %107, %113, %cst_90 {dimension_numbers = #tpu.dot_dimension_numbers<[1], [0], [0], [1], [0, 0, 1, 1], [], []>} : vector<8x128xbf16>, vector<128x384xbf16>, vector<8x384xf32> -> vector<8x384xf32>
      %c0_91 = arith.constant 0 : index
      %c0_92 = arith.constant 0 : index
      %115 = vector.load %arg7[%c0_91, %c0_92] : memref<1x384xf32, #tpu.memory_space<vmem>>, vector<1x384xf32>
      %116 = vector.broadcast %115 : vector<1x384xf32> to vector<8x384xf32>
      %117 = arith.addf %114, %116 : vector<8x384xf32>
      %118 = vector.extract_strided_slice %112 {offsets = [0, 0], sizes = [8, 128], strides = [1, 1]} : vector<8x384xf32> to vector<8x128xf32>
      %119 = vector.extract_strided_slice %117 {offsets = [0, 0], sizes = [8, 128], strides = [1, 1]} : vector<8x384xf32> to vector<8x128xf32>
      %120 = arith.addf %118, %119 : vector<8x128xf32>
      %121 = arith.negf %120 : vector<8x128xf32>
      %122 = math.exp %121 : vector<8x128xf32>
      %cst_93 = arith.constant 1.000000e+00 : f32
      %123 = vector.broadcast %cst_93 : f32 to vector<8x128xf32>
      %124 = arith.addf %123, %122 : vector<8x128xf32>
      %125 = arith.divf %123, %124 : vector<8x128xf32>
      %126 = vector.extract_strided_slice %112 {offsets = [0, 128], sizes = [8, 128], strides = [1, 1]} : vector<8x384xf32> to vector<8x128xf32>
      %127 = vector.extract_strided_slice %117 {offsets = [0, 128], sizes = [8, 128], strides = [1, 1]} : vector<8x384xf32> to vector<8x128xf32>
      %128 = arith.addf %126, %127 : vector<8x128xf32>
      %129 = arith.negf %128 : vector<8x128xf32>
      %130 = math.exp %129 : vector<8x128xf32>
      %cst_94 = arith.constant 1.000000e+00 : f32
      %131 = vector.broadcast %cst_94 : f32 to vector<8x128xf32>
      %132 = arith.addf %131, %130 : vector<8x128xf32>
      %133 = arith.divf %131, %132 : vector<8x128xf32>
      %134 = vector.extract_strided_slice %112 {offsets = [0, 256], sizes = [8, 128], strides = [1, 1]} : vector<8x384xf32> to vector<8x128xf32>
      %135 = vector.extract_strided_slice %117 {offsets = [0, 256], sizes = [8, 128], strides = [1, 1]} : vector<8x384xf32> to vector<8x128xf32>
      %136 = arith.mulf %125, %135 : vector<8x128xf32>
      %137 = arith.addf %134, %136 : vector<8x128xf32>
      %138 = math.tanh %137 : vector<8x128xf32>
      %cst_95 = arith.constant 1.000000e+00 : f32
      %139 = vector.broadcast %cst_95 : f32 to vector<8x128xf32>
      %140 = arith.subf %139, %133 : vector<8x128xf32>
      %141 = arith.mulf %140, %138 : vector<8x128xf32>
      %142 = arith.mulf %133, %106 : vector<8x128xf32>
      %143 = arith.addf %141, %142 : vector<8x128xf32>
      %c0_96 = arith.constant 0 : index
      %c0_97 = arith.constant 0 : index
      %144 = vector.load %arg11[%c0_96, %c0_97] : memref<8x128xf32, #tpu.memory_space<vmem>>, vector<8x128xf32>
      tpu.vector_store %arg11[%c0_96, %c0_97], %143 {strides = array<i32>} : memref<8x128xf32, #tpu.memory_space<vmem>>, vector<8x128xf32>,
      %cst_98 = arith.constant 0xFF800000 : f32
      %145 = vector.broadcast %cst_98 : f32 to vector<8x1xf32>
      %c0_99 = arith.constant 0 : index
      %c0_100 = arith.constant 0 : index
      %146 = vector.load %arg15[%c0_99, %c0_100] : memref<8x1xf32, #tpu.memory_space<vmem>>, vector<8x1xf32>
      tpu.vector_store %arg15[%c0_99, %c0_100], %145 {strides = array<i32>} : memref<8x1xf32, #tpu.memory_space<vmem>>, vector<8x1xf32>,
      %cst_101 = arith.constant 0.000000e+00 : f32
      %147 = vector.broadcast %cst_101 : f32 to vector<8x1xf32>
      %c0_102 = arith.constant 0 : index
      %c0_103 = arith.constant 0 : index
      %148 = vector.load %arg16[%c0_102, %c0_103] : memref<8x1xf32, #tpu.memory_space<vmem>>, vector<8x1xf32>
      tpu.vector_store %arg16[%c0_102, %c0_103], %147 {strides = array<i32>} : memref<8x1xf32, #tpu.memory_space<vmem>>, vector<8x1xf32>,
    } else {
    }
    %c0 = arith.constant 0 : index
    %c0_1 = arith.constant 0 : index
    %3 = vector.load %arg11[%c0, %c0_1] : memref<8x128xf32, #tpu.memory_space<vmem>>, vector<8x128xf32>
    %4 = arith.truncf %3 : vector<8x128xf32> to vector<8x128xbf16>
    %c0_2 = arith.constant 0 : index
    %c0_3 = arith.constant 0 : index
    %5 = vector.load %arg8[%c0_2, %c0_3] : memref<128x128xbf16, #tpu.memory_space<vmem>>, vector<128x128xbf16>
    %cst = arith.constant dense<0.000000e+00> : vector<8x128xf32>
    %6 = tpu.matmul %4, %5, %cst {dimension_numbers = #tpu.dot_dimension_numbers<[1], [0], [0], [1], [0, 0, 1, 1], [], []>} : vector<8x128xbf16>, vector<128x128xbf16>, vector<8x128xf32> -> vector<8x128xf32>
    %c0_4 = arith.constant 0 : index
    %c0_5 = arith.constant 0 : index
    %7 = vector.load %arg9[%c0_4, %c0_5] : memref<1x128xf32, #tpu.memory_space<vmem>>, vector<1x128xf32>
    %8 = vector.broadcast %7 : vector<1x128xf32> to vector<8x128xf32>
    %9 = arith.addf %6, %8 : vector<8x128xf32>
    %c0_6 = arith.constant 0 : index
    %c0_7 = arith.constant 0 : index
    %10 = vector.load %arg10[%c0_6, %c0_7] : memref<8x128xf32, #tpu.memory_space<vmem>>, vector<8x128xf32>
    tpu.vector_store %arg10[%c0_6, %c0_7], %9 {strides = array<i32>} : memref<8x128xf32, #tpu.memory_space<vmem>>, vector<8x128xf32>,
    %c0_8 = arith.constant 0 : index
    %c0_9 = arith.constant 0 : index
    %11 = vector.load %arg15[%c0_8, %c0_9] : memref<8x1xf32, #tpu.memory_space<vmem>>, vector<8x1xf32>
    %cst_10 = arith.constant dense<0xFF800000> : vector<8xf32>
    %12 = vector.multi_reduction <maximumf>, %9, %cst_10 [1] : vector<8x128xf32> to vector<8xf32>
    %13 = vector.shape_cast %12 : vector<8xf32> to vector<8x1xf32>
    %14 = arith.maximumf %11, %13 : vector<8x1xf32>
    %c0_11 = arith.constant 0 : index
    %c0_12 = arith.constant 0 : index
    %15 = vector.load %arg16[%c0_11, %c0_12] : memref<8x1xf32, #tpu.memory_space<vmem>>, vector<8x1xf32>
    %16 = arith.subf %11, %14 : vector<8x1xf32>
    %17 = math.exp %16 : vector<8x1xf32>
    %18 = arith.mulf %15, %17 : vector<8x1xf32>
    %19 = vector.broadcast %14 : vector<8x1xf32> to vector<8x128xf32>
    %20 = arith.subf %9, %19 : vector<8x128xf32>
    %21 = math.exp %20 : vector<8x128xf32>
    %cst_13 = arith.constant dense<0.000000e+00> : vector<8xf32>
    %22 = vector.multi_reduction <add>, %21, %cst_13 [1] : vector<8x128xf32> to vector<8xf32>
    %23 = vector.shape_cast %22 : vector<8xf32> to vector<8x1xf32>
    %24 = arith.addf %18, %23 : vector<8x1xf32>
    %c0_14 = arith.constant 0 : index
    %c0_15 = arith.constant 0 : index
    %25 = vector.load %arg16[%c0_14, %c0_15] : memref<8x1xf32, #tpu.memory_space<vmem>>, vector<8x1xf32>
    tpu.vector_store %arg16[%c0_14, %c0_15], %24 {strides = array<i32>} : memref<8x1xf32, #tpu.memory_space<vmem>>, vector<8x1xf32>,
    %c0_16 = arith.constant 0 : index
    %c0_17 = arith.constant 0 : index
    %26 = vector.load %arg15[%c0_16, %c0_17] : memref<8x1xf32, #tpu.memory_space<vmem>>, vector<8x1xf32>
    tpu.vector_store %arg15[%c0_16, %c0_17], %14 {strides = array<i32>} : memref<8x1xf32, #tpu.memory_space<vmem>>, vector<8x1xf32>,
    %c0_i32_18 = arith.constant 0 : i32
    %27 = arith.cmpi eq, %arg0, %c0_i32_18 : i32
    %28 = arith.extui %27 : i1 to i32
    %c0_i32_19 = arith.constant 0 : i32
    %29 = arith.cmpi ne, %28, %c0_i32_19 : i32
    scf.if %29 {
      %c0_20 = arith.constant 0 : index
      %c0_21 = arith.constant 0 : index
      %30 = vector.load %arg15[%c0_20, %c0_21] : memref<8x1xf32, #tpu.memory_space<vmem>>, vector<8x1xf32>
      %c0_22 = arith.constant 0 : index
      %c0_23 = arith.constant 0 : index
      %31 = vector.load %arg16[%c0_22, %c0_23] : memref<8x1xf32, #tpu.memory_space<vmem>>, vector<8x1xf32>
      %32 = math.log %31 : vector<8x1xf32>
      %33 = arith.addf %30, %32 : vector<8x1xf32>
      %c0_24 = arith.constant 0 : index
      %c0_25 = arith.constant 0 : index
      %34 = vector.load %arg12[%c0_24, %c0_25] : memref<8x1xf32, #tpu.memory_space<vmem>>, vector<8x1xf32>
      tpu.vector_store %arg12[%c0_24, %c0_25], %33 {strides = array<i32>} : memref<8x1xf32, #tpu.memory_space<vmem>>, vector<8x1xf32>,
    } else {
    }
    return
  }
  func.func @transform_1(%arg0: i32, %arg1: memref<8xi32, #tpu.memory_space<smem>>) -> (i32, i32) {
    %c0_i32 = arith.constant 0 : i32
    %c0_i32_0 = arith.constant 0 : i32
    %c0_i32_1 = arith.constant 0 : i32
    return %c0_i32, %c0_i32_0 : i32, i32
  }
  func.func @transform_2(%arg0: i32, %arg1: memref<8xi32, #tpu.memory_space<smem>>) -> (i32, i32) {
    %c0_i32 = arith.constant 0 : i32
    %c0_i32_0 = arith.constant 0 : i32
    %c0_i32_1 = arith.constant 0 : i32
    return %c0_i32, %c0_i32_0 : i32, i32
  }
  func.func @transform_3(%arg0: i32, %arg1: memref<8xi32, #tpu.memory_space<smem>>) -> (i32, i32) {
    %c0_i32 = arith.constant 0 : i32
    %c0_i32_0 = arith.constant 0 : i32
    %c0_i32_1 = arith.constant 0 : i32
    return %c0_i32, %c0_i32_0 : i32, i32
  }
  func.func @transform_4(%arg0: i32, %arg1: memref<8xi32, #tpu.memory_space<smem>>) -> (i32, i32) {
    %c0_i32 = arith.constant 0 : i32
    %c0_i32_0 = arith.constant 0 : i32
    %c0_i32_1 = arith.constant 0 : i32
    return %c0_i32, %c0_i32_0 : i32, i32
  }
  func.func @transform_5(%arg0: i32, %arg1: memref<8xi32, #tpu.memory_space<smem>>) -> (i32, i32) {
    %c0_i32 = arith.constant 0 : i32
    %c0_i32_0 = arith.constant 0 : i32
    %c0_i32_1 = arith.constant 0 : i32
    return %c0_i32, %c0_i32_0 : i32, i32
  }
  func.func @transform_6(%arg0: i32, %arg1: memref<8xi32, #tpu.memory_space<smem>>) -> (i32, i32) {
    %c0_i32 = arith.constant 0 : i32
    %c0_i32_0 = arith.constant 0 : i32
    return %c0_i32, %arg0 : i32, i32
  }
  func.func @transform_7(%arg0: i32, %arg1: memref<8xi32, #tpu.memory_space<smem>>) -> (i32, i32) {
    %c0_i32 = arith.constant 0 : i32
    %c0_i32_0 = arith.constant 0 : i32
    return %c0_i32, %arg0 : i32, i32
  }
  func.func @transform_8(%arg0: i32, %arg1: memref<8xi32, #tpu.memory_space<smem>>) -> (i32, i32) {
    %c0_i32 = arith.constant 0 : i32
    %c0_i32_0 = arith.constant 0 : i32
    return %c0_i32, %arg0 : i32, i32
  }
  func.func @transform_9(%arg0: i32, %arg1: memref<8xi32, #tpu.memory_space<smem>>) -> (i32, i32) {
    %c0_i32 = arith.constant 0 : i32
    %c0_i32_0 = arith.constant 0 : i32
    %c0_i32_1 = arith.constant 0 : i32
    return %c0_i32, %c0_i32_0 : i32, i32
  }
  func.func @transform_10(%arg0: i32, %arg1: memref<8xi32, #tpu.memory_space<smem>>) -> (i32, i32) {
    %c0_i32 = arith.constant 0 : i32
    %c0_i32_0 = arith.constant 0 : i32
    %c0_i32_1 = arith.constant 0 : i32
    return %c0_i32, %c0_i32_0 : i32, i32
  }
}

</mosaic_0001>

<bundles_post_ra>
// kernel: tpu_custom_call.1
= control target key start
LH: loop header
LB: loop body
LE: loop exit
PB: predicated region body
PF: predicated region fallthrough
CT: control target
= control target key end

     0   :  { %s1649_s17 = smov [#allocation7]   ;;  %s1940_s0 = inlined_call_operand.hbm [shape: s32[8], index: 0, kind: input, shape index: {}]   ;;  %s1941_s1 = inlined_call_operand.hbm [shape: f32[128,128], index: 1, kind: input, shape index: {}]   ;;  %s1942_s2 = inlined_call_operand.hbm [shape: f32[8,128], index: 2, kind: input, shape index: {}]   ;;  %s1943_s3 = inlined_call_operand.hbm [shape: bf16[128,384], index: 3, kind: input, shape index: {}]   ;;  %s1944_s4 = inlined_call_operand.vmem [shape: f32[1,384], index: 4, kind: input, shape index: {}]   ;;  %s1945_s5 = inlined_call_operand.hbm [shape: bf16[128,384], index: 5, kind: input, shape index: {}]   ;;  %s1946_s6 = inlined_call_operand.vmem [shape: f32[1,384], index: 6, kind: input, shape index: {}]   ;;  %s1947_s7 = inlined_call_operand.hbm [shape: bf16[128,128], index: 7, kind: input, shape index: {}]   ;;  %s1948_s8 = inlined_call_operand.vmem [shape: f32[1,128], index: 8, kind: input, shape index: {}]   ;;  %s1949_s9 = inlined_call_operand.hbm [shape: f32[8,128], index: 9, kind: output, shape index: {0}]   ;;  %s1950_s10 = inlined_call_operand.hbm [shape: f32[8,128], index: 10, kind: output, shape index: {1}]   ;;  %s1951_s11 = inlined_call_operand.vmem [shape: f32[8,1], index: 11, kind: output, shape index: {2}]  }
   0x1   :  { %18 = dma.hbm_to_smem %s1940_s0, 16, %s1649_s17, [#allocation6] }
   0x2   :  { %1621 = dma.done.wait [#allocation6], 16 }
   0x3   :  { %1622 = vsyncadd [#allocation6], 4294967280 }
   0x4   :  { %20 = sfence }
   0x5   :  { %21 = vsyncpa [#allocation9], 0 }
   0x6   :  { %22 = vsyncpa [#allocation12], 0 }
   0x7   :  { %23 = vsyncpa [#allocation15], 0 }
   0x8   :  { %24 = vsyncpa [#allocation10], 0 }
   0x9   :  { %25 = vsyncpa [#allocation18], 0  ;;  %s1650_s20 = smov [#allocation11]  }
   0xa   :  { %s41_s21 = sshll.u32 %s1650_s20, 4  ;;  %s42_s21 = int_to_ptr.vmem [resolvable:$true] %s41_s21 }
   0xb   :  { %s1333_s22 = scalar_lea.vmem %s42_s21, 3072  ;;  %p1338_p1 = scmp.lt.s32.totalorder %s42_s21, %s42_s21 }
   0xc   :  { %p1334_p0 = scmp.ne.s32.totalorder %s42_s21, %s1333_s22  ;;  %p1339_p2 = scmp.lt.s32.totalorder %s1333_s22, %s1333_s22 }
   0xe   :  { %p1340_p3 = por %p1339_p2, %p1338_p1 }
  0x10   :  { %p1341_p4 = pnand %p1340_p3, %p1334_p0 }
  0x12   :  { %1344 = shalt.err (!%p1341_p4)
}
  0x13   :  { %s1651_s23 = smov 192   ;;  %s1652_s0 = smov 12  }
  0x14   :  { %47 = dma.hbm_to_vmem [thread:$0]  %s1943_s3, 3072, %s42_s21, [#allocation12], %s1651_s23, %s1651_s23, %s1652_s0  }
  0x15   :  { %s1653_s26 = smov [#allocation8]   ;;  %s1654_s28 = smov [#allocation13]  }
  0x16   :  { %s32_s27 = sshll.u32 %s1653_s26, 4  ;;  %s55_s29 = sshll.u32 %s1654_s28, 4  ;;  %s33_s27 = int_to_ptr.vmem [resolvable:$true] %s32_s27  ;;  %s56_s29 = int_to_ptr.vmem [resolvable:$true] %s55_s29 }
  0x17   :  { %s1353_s30 = scalar_lea.vmem %s33_s27, 128  ;;  %p1358_p6 = scmp.lt.s32.totalorder %s33_s27, %s33_s27 }
  0x18   :  { %p1354_p5 = scmp.ne.s32.totalorder %s33_s27, %s1353_s30  ;;  %p1359_p7 = scmp.lt.s32.totalorder %s1353_s30, %s1353_s30 }
  0x1a   :  { %p1360_p8 = por %p1359_p7, %p1358_p6 }
  0x1c   :  { %p1361_p9 = pnand %p1360_p8, %p1354_p5 }
  0x1e   :  { %1364 = shalt.err (!%p1361_p9)
}
  0x1f   :  { %35 = dma.hbm_to_vmem [thread:$0]  %s1942_s2, 128, %s33_s27, [#allocation9]  }
  0x20   :  { %s1373_s14 = scalar_lea.vmem %s56_s29, 3072  ;;  %p1378_p11 = scmp.lt.s32.totalorder %s56_s29, %s56_s29 }
  0x21   :  { %p1374_p10 = scmp.ne.s32.totalorder %s56_s29, %s1373_s14  ;;  %p1379_p12 = scmp.lt.s32.totalorder %s1373_s14, %s1373_s14 }
  0x23   :  { %p1380_p13 = por %p1379_p12, %p1378_p11 }
  0x25   :  { %p1381_p0 = pnand %p1380_p13, %p1374_p10 }
  0x27   :  { %1384 = shalt.err (!%p1381_p0)
}
  0x28   :  { %61 = dma.hbm_to_vmem [thread:$0]  %s1945_s5, 3072, %s56_s29, [#allocation12], %s1651_s23, %s1651_s23, %s1652_s0  }
  0x29   :  { %s1655_s16 = smov [#allocation14]  }
  0x2a   :  { %s69_s17 = sshll.u32 %s1655_s16, 4  ;;  %s70_s17 = int_to_ptr.vmem [resolvable:$true] %s69_s17 }
  0x2b   :  { %s1393_s18 = scalar_lea.vmem %s70_s17, 1024  ;;  %p1398_p2 = scmp.lt.s32.totalorder %s70_s17, %s70_s17 }
  0x2c   :  { %p1394_p1 = scmp.ne.s32.totalorder %s70_s17, %s1393_s18  ;;  %p1399_p3 = scmp.lt.s32.totalorder %s1393_s18, %s1393_s18 }
  0x2e   :  { %p1400_p4 = por %p1399_p3, %p1398_p2 }
  0x30   :  { %p1401_p5 = pnand %p1400_p4, %p1394_p1 }
  0x32   :  { %1404 = shalt.err (!%p1401_p5)
}
  0x33   :  { %s1656_s2 = smov 64   ;;  %s1657_s19 = smov 4  }
  0x34   :  { %75 = dma.hbm_to_vmem [thread:$0]  %s1947_s7, 1024, %s70_s17, [#allocation15], %s1656_s2, %s1656_s2, %s1657_s19  }
  0x35   :  { %1623 = dma.done.wait [#allocation9], 128  }
  0x36   :  { %1624 = vsyncadd [#allocation9], 4294967168 }
  0x37   :  { %1625 = dma.done.wait [#allocation12], 6144  }
  0x38   :  { %1626 = vsyncadd [#allocation12], 4294961152 }
  0x39   :  { %1627 = dma.done.wait [#allocation15], 1024  }
  0x3a   :  { %1628 = vsyncadd [#allocation15], 4294966272  ;;  %s95_s5 = sld [smem:[#allocation7]]  ;;  %s1658_s22 = smov [#allocation2]  }
  0x3b   :  { %s112_s23 = sshll.u32 %s1658_s22, 4  ;;  %s1749_s0 = sld [smem:[#allocation7 + $0x1]]  ;;  %s1747_s23 = int_to_ptr.vmem [resolvable:$true] %s112_s23 }
  0x3c   :  { %s1659_s24 = smov [#allocation2 + $0x1]   ;;  %s1751_s26 = sld [smem:[#allocation7 + $0x2]] }
  0x3d   :  { %s127_s25 = sshll.u32 %s1659_s24, 4  ;;  %s1660_s7 = smov [#allocation2 + $0x2]   ;;  %s1753_s25 = int_to_ptr.vmem [resolvable:$true] %s127_s25 }
  0x3e   :  { %s142_s27 = sshll.u32 %s1660_s7, 4  ;;  %s1755_s28 = sld [smem:[#allocation7 + $0x3]]  ;;  %s1757_s27 = int_to_ptr.vmem [resolvable:$true] %s142_s27 }
  0x3f   :  { %s1661_s30 = smov [#allocation2 + $0x3]   ;;  %s1768_s2 = scalar_lea.hbm %s1941_s1, 2048 }
  0x40   :  { %s1043_s29 = sshll.u32 %s95_s5, 4  ;;  %s1759_s12 = sshll.u32 %s1661_s30, 4  ;;  %s158_s12 = int_to_ptr.vmem [resolvable:$true] %s1759_s12 }
  0x41   :  { %s104_s3 = scalar_lea.hbm %s1941_s1, %s1043_s29  ;;  %s1044_s15 = sshll.u32 %s1749_s0, 4 }
  0x42   :  { %s1405_s16 = scalar_lea.hbm %s104_s3, 16  ;;  %p1408_p7 = scmp.lt.s32.totalorder %s104_s3, %s1941_s1 }
  0x43   :  { %p1406_p6 = scmp.ne.s32.totalorder %s104_s3, %s1405_s16  ;;  %p1409_p8 = scmp.lt.s32.totalorder %s1768_s2, %s1405_s16 }
  0x45   :  { %p1410_p9 = por %p1409_p8, %p1408_p7 }
  0x47   :  { %p1411_p10 = pnand %p1410_p9, %p1406_p6 }
  0x49   :  { %1414 = shalt.err (!%p1411_p10)  }
  0x4a   :  { %s1415_s21 = scalar_lea.vmem %s1747_s23, 16  ;;  %s1777_s5 = scalar_lea.vmem %s1747_s23, 128 }
  0x4b   :  { %p1416_p11 = scmp.ne.s32.totalorder %s1747_s23, %s1415_s21  ;;  %p1420_p12 = scmp.lt.s32.totalorder %s1747_s23, %s1747_s23 }
  0x4c   :  { %p1421_p13 = scmp.lt.s32.totalorder %s1777_s5, %s1415_s21 }
  0x4e   :  { %p1422_p0 = por %p1421_p13, %p1420_p12 }
  0x50   :  { %p1423_p1 = pnand %p1422_p0, %p1416_p11 }
  0x52   :  { %1426 = shalt.err (!%p1423_p1)  }
  0x53   :  { %115 = dma.hbm_to_vmem [thread:$0]  %s104_s3, 16, %s1747_s23, [#allocation3] }
  0x54   :  { %s117_s24 = scalar_lea.hbm %s1941_s1, %s1044_s15  ;;  %s1045_s7 = sshll.u32 %s1751_s26, 4 }
  0x55   :  { %s1427_s29 = scalar_lea.hbm %s117_s24, 16  ;;  %p1430_p3 = scmp.lt.s32.totalorder %s117_s24, %s1941_s1 }
  0x56   :  { %p1428_p2 = scmp.ne.s32.totalorder %s117_s24, %s1427_s29  ;;  %p1431_p4 = scmp.lt.s32.totalorder %s1768_s2, %s1427_s29 }
  0x58   :  { %p1432_p5 = por %p1431_p4, %p1430_p3 }
  0x5a   :  { %p1433_p6 = pnand %p1432_p5, %p1428_p2 }
  0x5c   :  { %1436 = shalt.err (!%p1433_p6)  }
  0x5d   :  { %s1437_s14 = scalar_lea.vmem %s1753_s25, 16  ;;  %p1442_p8 = scmp.lt.s32.totalorder %s1753_s25, %s1747_s23 }
  0x5e   :  { %p1438_p7 = scmp.ne.s32.totalorder %s1753_s25, %s1437_s14  ;;  %p1443_p9 = scmp.lt.s32.totalorder %s1777_s5, %s1437_s14 }
  0x60   :  { %p1444_p10 = por %p1443_p9, %p1442_p8 }
  0x62   :  { %p1445_p11 = pnand %p1444_p10, %p1438_p7 }
  0x64   :  { %1448 = shalt.err (!%p1445_p11)  }
  0x65   :  { %130 = dma.hbm_to_vmem [thread:$0]  %s117_s24, 16, %s1753_s25, [#allocation3 + $0x1] }
  0x66   :  { %s132_s15 = scalar_lea.hbm %s1941_s1, %s1045_s7  ;;  %s1046_s16 = sshll.u32 %s1755_s28, 4 }
  0x67   :  { %s1449_s17 = scalar_lea.hbm %s132_s15, 16  ;;  %p1452_p13 = scmp.lt.s32.totalorder %s132_s15, %s1941_s1 }
  0x68   :  { %p1450_p12 = scmp.ne.s32.totalorder %s132_s15, %s1449_s17  ;;  %p1453_p0 = scmp.lt.s32.totalorder %s1768_s2, %s1449_s17 }
  0x6a   :  { %p1454_p1 = por %p1453_p0, %p1452_p13 }
  0x6c   :  { %p1455_p2 = pnand %p1454_p1, %p1450_p12 }
  0x6e   :  { %1458 = shalt.err (!%p1455_p2)  }
  0x6f   :  { %s1459_s25 = scalar_lea.vmem %s1757_s27, 16  ;;  %p1464_p4 = scmp.lt.s32.totalorder %s1757_s27, %s1747_s23 }
  0x70   :  { %p1460_p3 = scmp.ne.s32.totalorder %s1757_s27, %s1459_s25  ;;  %p1465_p5 = scmp.lt.s32.totalorder %s1777_s5, %s1459_s25 }
  0x72   :  { %p1466_p6 = por %p1465_p5, %p1464_p4 }
  0x74   :  { %p1467_p7 = pnand %p1466_p6, %p1460_p3 }
  0x76   :  { %1470 = shalt.err (!%p1467_p7)  }
  0x77   :  { %145 = dma.hbm_to_vmem [thread:$0]  %s132_s15, 16, %s1757_s27, [#allocation3 + $0x2] }
  0x78   :  { %s147_s21 = scalar_lea.hbm %s1941_s1, %s1046_s16 }
  0x79   :  { %s1471_s22 = scalar_lea.hbm %s147_s21, 16  ;;  %p1474_p9 = scmp.lt.s32.totalorder %s147_s21, %s1941_s1 }
  0x7a   :  { %p1472_p8 = scmp.ne.s32.totalorder %s147_s21, %s1471_s22  ;;  %p1475_p10 = scmp.lt.s32.totalorder %s1768_s2, %s1471_s22 }
  0x7c   :  { %p1476_p11 = por %p1475_p10, %p1474_p9 }
  0x7e   :  { %p1477_p12 = pnand %p1476_p11, %p1472_p8 }
  0x80   :  { %1480 = shalt.err (!%p1477_p12)  }
  0x81   :  { %s1481_s7 = scalar_lea.vmem %s158_s12, 16  ;;  %p1486_p0 = scmp.lt.s32.totalorder %s158_s12, %s1747_s23 }
  0x82   :  { %p1482_p13 = scmp.ne.s32.totalorder %s158_s12, %s1481_s7  ;;  %p1487_p1 = scmp.lt.s32.totalorder %s1777_s5, %s1481_s7 }
  0x84   :  { %p1488_p2 = por %p1487_p1, %p1486_p0 }
  0x86   :  { %p1489_p3 = pnand %p1488_p2, %p1482_p13 }
  0x88   :  { %1492 = shalt.err (!%p1489_p3)  }
  0x89   :  { %160 = dma.hbm_to_vmem [thread:$0]  %s147_s21, 16, %s158_s12, [#allocation3 + $0x3] }
  0x8a   :  { %s1039_s27 = sld [smem:[#allocation7 + $0x4]]  ;;  %s1662_s29 = smov [#allocation2 + $0x4]  }
  0x8b   :  { %s172_s30 = sshll.u32 %s1662_s29, 4  ;;  %s1821_s13 = sld [smem:[#allocation7 + $0x5]]  ;;  %s173_s30 = int_to_ptr.vmem [resolvable:$true] %s172_s30 }
  0x8c   :  { %s1663_s14 = smov [#allocation2 + $0x5]   ;;  %s1823_s3 = sld [smem:[#allocation7 + $0x6]] }
  0x8d   :  { %s187_s26 = sshll.u32 %s1663_s14, 4  ;;  %s1664_s15 = smov [#allocation2 + $0x6]   ;;  %s1825_s26 = int_to_ptr.vmem [resolvable:$true] %s187_s26 }
  0x8e   :  { %s202_s16 = sshll.u32 %s1664_s15, 4  ;;  %s1827_s17 = sld [smem:[#allocation7 + $0x7]]  ;;  %s1829_s16 = int_to_ptr.vmem [resolvable:$true] %s202_s16 }
  0x90   :  { %s1047_s18 = sshll.u32 %s1039_s27, 4 }
  0x91   :  { %s162_s25 = scalar_lea.hbm %s1941_s1, %s1047_s18  ;;  %s1048_s28 = sshll.u32 %s1821_s13, 4 }
  0x92   :  { %s1493_s20 = scalar_lea.hbm %s162_s25, 16  ;;  %p1496_p5 = scmp.lt.s32.totalorder %s162_s25, %s1941_s1 }
  0x93   :  { %p1494_p4 = scmp.ne.s32.totalorder %s162_s25, %s1493_s20  ;;  %p1497_p6 = scmp.lt.s32.totalorder %s1768_s2, %s1493_s20 }
  0x95   :  { %p1498_p7 = por %p1497_p6, %p1496_p5 }
  0x97   :  { %p1499_p8 = pnand %p1498_p7, %p1494_p4 }
  0x99   :  { %1502 = shalt.err (!%p1499_p8)  }
  0x9a   :  { %s1503_s0 = scalar_lea.vmem %s173_s30, 16  ;;  %p1508_p10 = scmp.lt.s32.totalorder %s173_s30, %s1747_s23 }
  0x9b   :  { %p1504_p9 = scmp.ne.s32.totalorder %s173_s30, %s1503_s0  ;;  %p1509_p11 = scmp.lt.s32.totalorder %s1777_s5, %s1503_s0 }
  0x9d   :  { %p1510_p12 = por %p1509_p11, %p1508_p10 }
  0x9f   :  { %p1511_p13 = pnand %p1510_p12, %p1504_p9 }
  0xa1   :  { %1514 = shalt.err (!%p1511_p13)  }
  0xa2   :  { %175 = dma.hbm_to_vmem [thread:$0]  %s162_s25, 16, %s173_s30, [#allocation3 + $0x4] }
  0xa3   :  { %s177_s27 = scalar_lea.hbm %s1941_s1, %s1048_s28  ;;  %s1049_s29 = sshll.u32 %s1823_s3, 4 }
  0xa4   :  { %s1515_s13 = scalar_lea.hbm %s177_s27, 16  ;;  %p1518_p1 = scmp.lt.s32.totalorder %s177_s27, %s1941_s1 }
  0xa5   :  { %p1516_p0 = scmp.ne.s32.totalorder %s177_s27, %s1515_s13  ;;  %p1519_p2 = scmp.lt.s32.totalorder %s1768_s2, %s1515_s13 }
  0xa7   :  { %p1520_p3 = por %p1519_p2, %p1518_p1 }
  0xa9   :  { %p1521_p4 = pnand %p1520_p3, %p1516_p0 }
  0xab   :  { %1524 = shalt.err (!%p1521_p4)  }
  0xac   :  { %s1525_s30 = scalar_lea.vmem %s1825_s26, 16  ;;  %p1530_p6 = scmp.lt.s32.totalorder %s1825_s26, %s1747_s23 }
  0xad   :  { %p1526_p5 = scmp.ne.s32.totalorder %s1825_s26, %s1525_s30  ;;  %p1531_p7 = scmp.lt.s32.totalorder %s1777_s5, %s1525_s30 }
  0xaf   :  { %p1532_p8 = por %p1531_p7, %p1530_p6 }
  0xb1   :  { %p1533_p9 = pnand %p1532_p8, %p1526_p5 }
  0xb3   :  { %1536 = shalt.err (!%p1533_p9)  }
  0xb4   :  { %190 = dma.hbm_to_vmem [thread:$0]  %s177_s27, 16, %s1825_s26, [#allocation3 + $0x5] }
  0xb5   :  { %s192_s12 = scalar_lea.hbm %s1941_s1, %s1049_s29  ;;  %s1050_s19 = sshll.u32 %s1827_s17, 4 }
  0xb6   :  { %s1537_s25 = scalar_lea.hbm %s192_s12, 16  ;;  %p1540_p11 = scmp.lt.s32.totalorder %s192_s12, %s1941_s1 }
  0xb7   :  { %p1538_p10 = scmp.ne.s32.totalorder %s192_s12, %s1537_s25  ;;  %p1541_p12 = scmp.lt.s32.totalorder %s1768_s2, %s1537_s25 }
  0xb9   :  { %p1542_p13 = por %p1541_p12, %p1540_p11 }
  0xbb   :  { %p1543_p0 = pnand %p1542_p13, %p1538_p10 }
  0xbd   :  { %1546 = shalt.err (!%p1543_p0)  }
  0xbe   :  { %s1547_s26 = scalar_lea.vmem %s1829_s16, 16  ;;  %p1552_p2 = scmp.lt.s32.totalorder %s1829_s16, %s1747_s23 }
  0xbf   :  { %p1548_p1 = scmp.ne.s32.totalorder %s1829_s16, %s1547_s26  ;;  %p1553_p3 = scmp.lt.s32.totalorder %s1777_s5, %s1547_s26 }
  0xc1   :  { %p1554_p4 = por %p1553_p3, %p1552_p2 }
  0xc3   :  { %p1555_p5 = pnand %p1554_p4, %p1548_p1 }
  0xc5   :  { %1558 = shalt.err (!%p1555_p5)  }
  0xc6   :  { %205 = dma.hbm_to_vmem [thread:$0]  %s192_s12, 16, %s1829_s16, [#allocation3 + $0x6] }
  0xc7   :  { %s207_s22 = scalar_lea.hbm %s1941_s1, %s1050_s19  ;;  %s1665_s0 = smov [#allocation2 + $0x7]  }
  0xc8   :  { %s217_s24 = sshll.u32 %s1665_s0, 4  ;;  %s1559_s7 = scalar_lea.hbm %s207_s22, 16  ;;  %s218_s24 = int_to_ptr.vmem [resolvable:$true] %s217_s24 }
  0xc9   :  { %p1560_p6 = scmp.ne.s32.totalorder %s207_s22, %s1559_s7  ;;  %p1562_p7 = scmp.lt.s32.totalorder %s207_s22, %s1941_s1 }
  0xca   :  { %p1563_p8 = scmp.lt.s32.totalorder %s1768_s2, %s1559_s7 }
  0xcc   :  { %p1564_p9 = por %p1563_p8, %p1562_p7 }
  0xce   :  { %p1565_p10 = pnand %p1564_p9, %p1560_p6 }
  0xd0   :  { %1568 = shalt.err (!%p1565_p10)  }
  0xd1   :  { %s1569_s13 = scalar_lea.vmem %s218_s24, 16  ;;  %p1574_p12 = scmp.lt.s32.totalorder %s218_s24, %s1747_s23 }
  0xd2   :  { %p1570_p11 = scmp.ne.s32.totalorder %s218_s24, %s1569_s13  ;;  %p1575_p13 = scmp.lt.s32.totalorder %s1777_s5, %s1569_s13 }
  0xd4   :  { %p1576_p0 = por %p1575_p13, %p1574_p12 }
  0xd6   :  { %p1577_p1 = pnand %p1576_p0, %p1570_p11 }
  0xd8   :  { %1580 = shalt.err (!%p1577_p1)  }
  0xd9   :  { %220 = dma.hbm_to_vmem [thread:$0]  %s207_s22, 16, %s218_s24, [#allocation3 + $0x7] }
  0xda   :  { %1629 = dma.done.wait [#allocation3], 16 }
  0xdb   :  { %1630 = vsyncadd [#allocation3], 4294967280 }
  0xdc   :  { %1631 = dma.done.wait [#allocation3 + $0x1], 16 }
  0xdd   :  { %1632 = vsyncadd [#allocation3 + $0x1], 4294967280 }
  0xde   :  { %1633 = dma.done.wait [#allocation3 + $0x2], 16 }
  0xdf   :  { %1634 = vsyncadd [#allocation3 + $0x2], 4294967280 }
  0xe0   :  { %1635 = dma.done.wait [#allocation3 + $0x3], 16 }
  0xe1   :  { %1636 = vsyncadd [#allocation3 + $0x3], 4294967280 }
  0xe2   :  { %1637 = dma.done.wait [#allocation3 + $0x4], 16 }
  0xe3   :  { %1638 = vsyncadd [#allocation3 + $0x4], 4294967280 }
  0xe4   :  { %1639 = dma.done.wait [#allocation3 + $0x5], 16 }
  0xe5   :  { %1640 = vsyncadd [#allocation3 + $0x5], 4294967280 }
  0xe6   :  { %1641 = dma.done.wait [#allocation3 + $0x6], 16 }
  0xe7   :  { %1642 = vsyncadd [#allocation3 + $0x6], 4294967280 }
  0xe8   :  { %1643 = dma.done.wait [#allocation3 + $0x7], 16 }
  0xe9   :  { %1644 = vsyncadd [#allocation3 + $0x7], 4294967280  ;;  %v1666_v0 = vmov 0.0   ;;  %v1667_v1 = vmov 0   ;;  %vm1668_vm0 = vmmov 0   ;;  %v238_v20 = vld [vmem:[#allocation2] sm:$0xff] }
  0xea   :  { %1145 = vmatprep.subr.bf16.mxu1 %v1666_v0  ;;  %452 = vmatprep.mubr.bf16.mxu0 %v1667_v1  ;;  %v1229_v2 = vld [vmem:[#allocation11 + $0xac] ss:$12 sps:$4 sm:$0xff]   ;;  %v1231_v3 = vld [vmem:[#allocation11 + $0xa8] ss:$12 sps:$4 sm:$0xff]   ;;  %v1234_v5 = vld [vmem:[#allocation11 + $0x90] ss:$12 sps:$4 sm:$0xff]  }
  0xeb   :  { %1161 = vmatprep.mubr.msk.bf16.mxu1 %vm1668_vm0, %v1666_v0  ;;  %1228 = vset.pattern.permute.xlu0 %v1667_v1  ;;  %v1232_v4 = vld [vmem:[#allocation11 + $0x94] ss:$12 sps:$4 sm:$0xff]   ;;  %v1235_v6 = vld [vmem:[#allocation11 + $0x7c] ss:$12 sps:$4 sm:$0xff]   ;;  %v1237_v7 = vld [vmem:[#allocation11 + $0x78] ss:$12 sps:$4 sm:$0xff]  }
  0xec   :  { %420 = vmatprep.subr.bf16.mxu0 %v1229_v2  ;;  %v1238_v8 = vld [vmem:[#allocation11 + $0x64] ss:$12 sps:$4 sm:$0xff]   ;;  %v1240_v9 = vld [vmem:[#allocation11 + $0x60] ss:$12 sps:$4 sm:$0xff]   ;;  %v1243_v13 = vld [vmem:[#allocation11 + $0x48] ss:$12 sps:$4 sm:$0xff]  }
  0xed   :  { %421 = vmatpush1.bf16.msra.mxu0 %v1231_v3  ;;  %v1253_v10 = vld [vmem:[#allocation11 + $0xb0] ss:$12 sps:$4 sm:$0xff]   ;;  %v1241_v11 = vld [vmem:[#allocation11 + $0x4c] ss:$12 sps:$4 sm:$0xff]   ;;  %v1244_v14 = vld [vmem:[#allocation11 + $0x34] ss:$12 sps:$4 sm:$0xff]  }
  0xee   :  { %422 = vmatprep.subr.bf16.mxu0 %v1232_v4  ;;  %1146 = vmatpush3.bf16.msra.mxu1 %v1253_v10  ;;  %v1257_v12 = vld [vmem:[#allocation11 + $0x98] ss:$12 sps:$4 sm:$0xff]   ;;  %v1261_v15 = vld [vmem:[#allocation11 + $0x80] ss:$12 sps:$4 sm:$0xff]   ;;  %v1246_v16 = vld [vmem:[#allocation11 + $0x30] ss:$12 sps:$4 sm:$0xff]  }
  0xef   :  { %1147 = vmatprep.subr.bf16.mxu1 %v1666_v0  ;;  %v1247_v17 = vld [vmem:[#allocation11 + $0x1c] ss:$12 sps:$4 sm:$0xff]   ;;  %v1249_v19 = vld [vmem:[#allocation11 + $0x18] ss:$12 sps:$4 sm:$0xff]   ;;  %v239_v23 = vmax.f32 %v238_v20, 0.0  ;;  %v1294_v56 = vld [vmem:[#allocation14 + $0x30] sm:$0xff]  }
  0xf0   :  { %v1265_v18 = vld [vmem:[#allocation11 + $0x68] ss:$12 sps:$4 sm:$0xff]   ;;  %v1250_v21 = vld [vmem:[#allocation11 + $0x4] ss:$12 sps:$4 sm:$0xff]   ;;  %v1252_v24 = vld [vmem:[#allocation11] ss:$12 sps:$4 sm:$0xff]  }
  0xf1   :  { %423 = vmatpush1.bf16.msra.mxu0 %v1234_v5  ;;  %v1269_v22 = vld [vmem:[#allocation11 + $0x50] ss:$12 sps:$4 sm:$0xff]   ;;  %v1256_v25 = vld [vmem:[#allocation13 + $0xac] ss:$12 sps:$4 sm:$0xff]   ;;  %v240_v27 = vpack.c.bf16 %v239_v23, %v239_v23  ;;  %v1254_v28 = vld [vmem:[#allocation13 + $0xa8] ss:$12 sps:$4 sm:$0xff]  }
  0xf2   :  { %424 = vmatprep.subr.bf16.mxu0 %v1235_v6  ;;  %1148 = vmatpush3.bf16.msra.mxu1 %v1257_v12  ;;  %v1273_v26 = vld [vmem:[#allocation11 + $0x38] ss:$12 sps:$4 sm:$0xff]   ;;  %v1260_v29 = vld [vmem:[#allocation13 + $0x94] ss:$12 sps:$4 sm:$0xff]   ;;  %v1258_v31 = vld [vmem:[#allocation13 + $0x90] ss:$12 sps:$4 sm:$0xff]  }
  0xf3   :  { %1149 = vmatprep.subr.bf16.mxu1 %v1666_v0  ;;  %v1277_v30 = vld [vmem:[#allocation11 + $0x20] ss:$12 sps:$4 sm:$0xff]   ;;  %v1264_v32 = vld [vmem:[#allocation13 + $0x7c] ss:$12 sps:$4 sm:$0xff]   ;;  %v1262_v33 = vld [vmem:[#allocation13 + $0x78] ss:$12 sps:$4 sm:$0xff]  }
  0xf4   :  { %v1281_v34 = vld [vmem:[#allocation11 + $0x8] ss:$12 sps:$4 sm:$0xff]   ;;  %v1268_v35 = vld [vmem:[#allocation13 + $0x64] ss:$12 sps:$4 sm:$0xff]   ;;  %v1266_v37 = vld [vmem:[#allocation13 + $0x60] ss:$12 sps:$4 sm:$0xff]  }
  0xf5   :  { %425 = vmatpush1.bf16.msra.mxu0 %v1237_v7  ;;  %v1285_v36 = vld [vmem:[#allocation13 + $0xb0] ss:$12 sps:$4 sm:$0xff]   ;;  %v1272_v38 = vld [vmem:[#allocation13 + $0x4c] ss:$12 sps:$4 sm:$0xff]   ;;  %v1270_v40 = vld [vmem:[#allocation13 + $0x48] ss:$12 sps:$4 sm:$0xff]  }
  0xf6   :  { %426 = vmatprep.subr.bf16.mxu0 %v1238_v8  ;;  %1150 = vmatpush3.bf16.msra.mxu1 %v1261_v15  ;;  %v1286_v39 = vld [vmem:[#allocation13 + $0x98] ss:$12 sps:$4 sm:$0xff]   ;;  %v1276_v41 = vld [vmem:[#allocation13 + $0x34] ss:$12 sps:$4 sm:$0xff]   ;;  %v1274_v43 = vld [vmem:[#allocation13 + $0x30] ss:$12 sps:$4 sm:$0xff]   ;;  %v277_v8 = vlaneseq }
  0xf7   :  { %1151 = vmatprep.subr.bf16.mxu1 %v1666_v0  ;;  %v1287_v42 = vld [vmem:[#allocation13 + $0x80] ss:$12 sps:$4 sm:$0xff]   ;;  %v1280_v44 = vld [vmem:[#allocation13 + $0x1c] ss:$12 sps:$4 sm:$0xff]   ;;  %v1278_v46 = vld [vmem:[#allocation13 + $0x18] ss:$12 sps:$4 sm:$0xff]  }
  0xf8   :  { %v1288_v45 = vld [vmem:[#allocation13 + $0x68] ss:$12 sps:$4 sm:$0xff]   ;;  %v1284_v47 = vld [vmem:[#allocation13 + $0x4] ss:$12 sps:$4 sm:$0xff]   ;;  %v1282_v49 = vld [vmem:[#allocation13] ss:$12 sps:$4 sm:$0xff]  }
  0xf9   :  { %427 = vmatpush1.bf16.msra.mxu0 %v1240_v9  ;;  %v1289_v48 = vld [vmem:[#allocation13 + $0x50] ss:$12 sps:$4 sm:$0xff]   ;;  %v1290_v51 = vld [vmem:[#allocation13 + $0x38] ss:$12 sps:$4 sm:$0xff]   ;;  %v1291_v53 = vld [vmem:[#allocation13 + $0x20] ss:$12 sps:$4 sm:$0xff]  }
  0xfa   :  { %428 = vmatprep.subr.bf16.mxu0 %v1241_v11  ;;  %1152 = vmatpush3.bf16.msra.mxu1 %v1265_v18  ;;  %v1898_v50 = vld [vmem:[#allocation8] sm:$0xff]  ;;  %v1292_v54 = vld [vmem:[#allocation13 + $0x8] ss:$12 sps:$4 sm:$0xff]   ;;  %v1296_v58 = vld [vmem:[#allocation14 + $0x20] sm:$0xff]   ;;  %v278_v9 = vshrl.u32 %v277_v8, 7  ;;  %vm781_vm1 = vcmask 7168  }
  0xfb   :  { %1153 = vmatprep.subr.bf16.mxu1 %v1666_v0  ;;  %v242_v52 = vpack.c.bf16 %v1898_v50, %v1898_v50  ;;  %v1293_v55 = vld [vmem:[#allocation14 + $0x38] sm:$0xff]   ;;  %v1295_v57 = vld [vmem:[#allocation14 + $0x28] sm:$0xff]   ;;  %v1298_v60 = vld [vmem:[#allocation14 + $0x10] sm:$0xff]   ;;  %783 = vst.msk [vmem:[#allocation5] sm:$0xff] %vm781_vm1, %v1666_v0  ;;  %s1671_s14 = smov [#allocation17]  }
  0xfc   :  { %v1297_v59 = vld [vmem:[#allocation14 + $0x18] sm:$0xff]   ;;  %v1299_v61 = vld [vmem:[#allocation14 + $0x8] sm:$0xff]   ;;  %v1300_v62 = vld [vmem:[#allocation14] sm:$0xff]   ;;  %v279_v10 = vsub.s32 0, %v278_v9  ;;  %v283_v15 = vsub.s32 1, %v278_v9  ;;  %s946_s15 = sshll.u32 %s1671_s14, 4  ;;  %s947_s15 = int_to_ptr.vmem [resolvable:$true] %s946_s15 }
  0xfd   :  { %429 = vmatpush1.bf16.msra.mxu0 %v1243_v13  ;;  %v275_v11 = vld [vmem:[%s1944_s4] sm:$0x7] }
  0xfe   :  { %430 = vmatprep.subr.bf16.mxu0 %v1244_v14  ;;  %1154 = vmatpush3.bf16.msra.mxu1 %v1269_v22  ;;  %v533_v12 = vld [vmem:[%s1946_s6] sm:$0x7]  ;;  %v280_v13 = vrot.slane %v275_v11, %v279_v10 }
  0xff   :  { %1155 = vmatprep.subr.bf16.mxu1 %v1666_v0  ;;  %v538_v14 = vrot.slane %v533_v12, %v279_v10 }
 0x101   :  { %431 = vmatpush1.bf16.msra.mxu0 %v1246_v16 }
 0x102   :  { %432 = vmatprep.subr.bf16.mxu0 %v1247_v17  ;;  %1156 = vmatpush3.bf16.msra.mxu1 %v1273_v26 }
 0x103   :  { %1157 = vmatprep.subr.bf16.mxu1 %v1666_v0 }
 0x105   :  { %433 = vmatpush1.bf16.msra.mxu0 %v1249_v19  ;;  %v542_v19 = vrot.slane %v533_v12, %v283_v15 }
 0x106   :  { %434 = vmatprep.subr.bf16.mxu0 %v1250_v21  ;;  %1158 = vmatpush3.bf16.msra.mxu1 %v1277_v30  ;;  %v284_v21 = vrot.slane %v275_v11, %v283_v15 }
 0x107   :  { %1159 = vmatprep.subr.bf16.mxu1 %v1666_v0 }
 0x109   :  { %435 = vmatpush1.bf16.msra.mxu0 %v1252_v24 }
 0x10a   :  { %678 = vmatprep.subr.bf16.mxu0 %v1256_v25  ;;  %1160 = vmatpush3.bf16.msra.mxu1 %v1281_v34 }
 0x10b   :  { %1165 = vmatprep.subr.bf16.mxu1 %v1666_v0 }
 0x10c   :  { %453 = vmatmul.mubr.bf16.vlgmr.msra.gmra.mxu0 %v240_v27 }
 0x10d   :  { %679 = vmatpush1.bf16.msra.mxu0 %v1254_v28  ;;  %710 = vmatprep.mubr.bf16.mxu0 %v1667_v1 }
 0x10e   :  { %680 = vmatprep.subr.bf16.mxu0 %v1260_v29  ;;  %1162 = vmatmul.mubr.bf16.vlgmr.msra.gmra.mxu1 %v240_v27 }
 0x10f   :  { %1166 = vmatpush3.bf16.msra.mxu1 %v1285_v36  ;;  %1181 = vmatprep.mubr.msk.bf16.mxu1 %vm1668_vm0, %v1666_v0  ;;  %v287_v36 = vsub.s32 2, %v278_v9 }
 0x110   :  { %1167 = vmatprep.subr.bf16.mxu1 %v1666_v0 }
 0x111   :  { %681 = vmatpush1.bf16.msra.mxu0 %v1258_v31 }
 0x112   :  { %682 = vmatprep.subr.bf16.mxu0 %v1264_v32 }
 0x113   :  { %1168 = vmatpush3.bf16.msra.mxu1 %v1286_v39  ;;  %v288_v39 = vrot.slane %v275_v11, %v287_v36 }
 0x114   :  { %1169 = vmatprep.subr.bf16.mxu1 %v1666_v0 }
 0x115   :  { %683 = vmatpush1.bf16.msra.mxu0 %v1262_v33 }
 0x116   :  { %684 = vmatprep.subr.bf16.mxu0 %v1268_v35 }
 0x117   :  { %1170 = vmatpush3.bf16.msra.mxu1 %v1287_v42 }
 0x118   :  { %1171 = vmatprep.subr.bf16.mxu1 %v1666_v0 }
 0x119   :  { %685 = vmatpush1.bf16.msra.mxu0 %v1266_v37  ;;  %v546_v37 = vrot.slane %v533_v12, %v287_v36 }
 0x11a   :  { %686 = vmatprep.subr.bf16.mxu0 %v1272_v38 }
 0x11b   :  { %1172 = vmatpush3.bf16.msra.mxu1 %v1288_v45 }
 0x11c   :  { %1173 = vmatprep.subr.bf16.mxu1 %v1666_v0 }
 0x11d   :  { %687 = vmatpush1.bf16.msra.mxu0 %v1270_v40 }
 0x11e   :  { %688 = vmatprep.subr.bf16.mxu0 %v1276_v41 }
 0x11f   :  { %1174 = vmatpush3.bf16.msra.mxu1 %v1289_v48 }
 0x120   :  { %1175 = vmatprep.subr.bf16.mxu1 %v1666_v0 }
 0x121   :  { %689 = vmatpush1.bf16.msra.mxu0 %v1274_v43 }
 0x122   :  { %690 = vmatprep.subr.bf16.mxu0 %v1280_v44 }
 0x123   :  { %1176 = vmatpush3.bf16.msra.mxu1 %v1290_v51 }
 0x124   :  { %1177 = vmatprep.subr.bf16.mxu1 %v1666_v0 }
 0x125   :  { %691 = vmatpush1.bf16.msra.mxu0 %v1278_v46 }
 0x126   :  { %692 = vmatprep.subr.bf16.mxu0 %v1284_v47 }
 0x127   :  { %1178 = vmatpush3.bf16.msra.mxu1 %v1291_v53 }
 0x128   :  { %1179 = vmatprep.subr.bf16.mxu1 %v1666_v0 }
 0x129   :  { %693 = vmatpush1.bf16.msra.mxu0 %v1282_v49 }
 0x12a   :  { %1185 = vmatprep.subr.bf16.mxu0 %v1666_v0 }
 0x12b   :  { %1180 = vmatpush3.bf16.msra.mxu1 %v1292_v54  ;;  %v1669_v54 = vmov -inf  }
 0x12c   :  { %711 = vmatmul.mubr.bf16.vlgmr.msra.gmra.mxu0 %v242_v52  ;;  %782 = vst.msk [vmem:[#allocation4] sm:$0xff] %vm781_vm1, %v1669_v54 }
 0x12d   :  { %1201 = vmatprep.mubr.msk.bf16.mxu0 %vm1668_vm0, %v1666_v0  ;;  %1186 = vmatpush3.bf16.msra.mxu0 %v1293_v55  ;;  %v1101_v55 = vld [vmem:[%s1948_s8] ss:$0 sm:$0xff]  ;;  %s1670_s8 = smov [#allocation16]  }
 0x12e   :  { %1182 = vmatmul.mubr.bf16.vlgmr.msra.gmra.mxu1 %v242_v52  ;;  %1187 = vmatprep.subr.bf16.mxu0 %v1666_v0  ;;  %s936_s16 = sshll.u32 %s1670_s8, 4  ;;  %s937_s16 = int_to_ptr.vmem [resolvable:$true] %s936_s16 }
 0x12f   :  { %s1581_s30 = scalar_lea.vmem %s937_s16, 128  ;;  %p1586_p3 = scmp.lt.s32.totalorder %s937_s16, %s937_s16 }
 0x130   :  { %p1582_p2 = scmp.ne.s32.totalorder %s937_s16, %s1581_s30  ;;  %p1587_p4 = scmp.lt.s32.totalorder %s1581_s30, %s1581_s30 }
 0x131   :  { %1188 = vmatpush3.bf16.msra.mxu0 %v1294_v56 }
 0x132   :  { %1189 = vmatprep.subr.bf16.mxu0 %v1666_v0  ;;  %p1588_p5 = por %p1587_p4, %p1586_p3 }
 0x134   :  { %p1589_p6 = pnand %p1588_p5, %p1582_p2 }
 0x135   :  { %1190 = vmatpush3.bf16.msra.mxu0 %v1295_v57 }
 0x136   :  { %1191 = vmatprep.subr.bf16.mxu0 %v1666_v0 }
 0x139   :  { %1192 = vmatpush3.bf16.msra.mxu0 %v1296_v58 }
 0x13a   :  { %1193 = vmatprep.subr.bf16.mxu0 %v1666_v0 }
 0x13d   :  { %1194 = vmatpush3.bf16.msra.mxu0 %v1297_v59 }
 0x13e   :  { %1195 = vmatprep.subr.bf16.mxu0 %v1666_v0 }
 0x141   :  { %1196 = vmatpush3.bf16.msra.mxu0 %v1298_v60  ;;  %v898_v60 = vld [vmem:[#allocation4] sm:$0xff] }
 0x142   :  { %1197 = vmatprep.subr.bf16.mxu0 %v1666_v0 }
 0x145   :  { %1198 = vmatpush3.bf16.msra.mxu0 %v1299_v61 }
 0x146   :  { %1199 = vmatprep.subr.bf16.mxu0 %v1666_v0 }
 0x149   :  { %1200 = vmatpush3.bf16.msra.mxu0 %v1300_v62 }
 0x1cc   :  { %v454_v63 = vpop.f32.mrf.mxu0 }
 0x1cd   :  { %v455_v17 = vadd.f32 %v454_v63, %v280_v13 }
 0x1ce   :  { %v456_v1 = vpop.f32.mrf.mxu0  ;;  %v495_v4 = vpop.f32.mrf.mxu1 }
 0x1cf   :  { %v457_v27 = vadd.f32 %v456_v1, %v284_v21  ;;  %v496_v43 = vadd.f32 %v495_v4, %v288_v39 }
 0x1d0   :  { %v458_v2 = vpop.f32.mrf.mxu0  ;;  %v1163_v5 = vpop.f32.mrf.mxu1 }
 0x1d2   :  { %v459_v3 = vpop.f32.mrf.mxu0  ;;  %v498_v6 = vpop.f32.mrf.mxu1 }
 0x1d4   :  { %v1164_v7 = vpop.f32.mrf.mxu1 }
 0x1ec   :  { %v712_v16 = vpop.f32.mrf.mxu0 }
 0x1ed   :  { %v713_v18 = vadd.f32 %v712_v16, %v538_v14 }
 0x1ee   :  { %v714_v20 = vpop.f32.mrf.mxu0  ;;  %v753_v29 = vpop.f32.mrf.mxu1 }
 0x1ef   :  { %v759_v22 = vadd.f32 %v713_v18, %v455_v17  ;;  %v715_v25 = vadd.f32 %v714_v20, %v542_v19  ;;  %v754_v41 = vadd.f32 %v753_v29, %v546_v37 }
 0x1f0   :  { %v716_v23 = vpop.f32.mrf.mxu0  ;;  %v1183_v30 = vpop.f32.mrf.mxu1 }
 0x1f1   :  { %v1099_v24 = vmul.f32 -1.442695, %v759_v22  ;;  %v766_v28 = vadd.f32 %v715_v25, %v457_v27 }
 0x1f2   :  { %v717_v26 = vpop.f32.mrf.mxu0  ;;  %v756_v32 = vpop.f32.mrf.mxu1 }
 0x1f3   :  { %1301 = vpow2.f32 %v1099_v24  ;;  %v1100_v31 = vmul.f32 -1.442695, %v766_v28 }
 0x1f4   :  { %v1184_v33 = vpop.f32.mrf.mxu1 }
 0x1f5   :  { %1303 = vpow2.f32 %v1100_v31 }
 0x200   :  { %v1302_v34 = vpop.eup %1301 }
 0x201   :  { %v763_v35 = vadd.f32 1.0, %v1302_v34 }
 0x202   :  { %v1304_v38 = vpop.eup %1303 }
 0x203   :  { %1305 = vrcp.f32 %v763_v35  ;;  %v770_v40 = vadd.f32 1.0, %v1304_v38 }
 0x205   :  { %1307 = vrcp.f32 %v770_v40 }
 0x210   :  { %v1306_v42 = vpop.eup %1305 }
 0x211   :  { %v773_v44 = vmul.f32 %v1306_v42, %v754_v41 }
 0x212   :  { %v1308_v46 = vpop.eup %1307 }
 0x213   :  { %v774_v45 = vadd.f32 %v773_v44, %v496_v43  ;;  %v776_v47 = vsub.f32 1.0, %v1308_v46  ;;  %v778_v49 = vmul.f32 %v1308_v46, %v1898_v50 }
 0x215   :  { %1309 = vtanh.f32 %v774_v45 }
 0x222   :  { %v1310_v48 = vpop.eup %1309 }
 0x223   :  { %v777_v51 = vmul.f32 %v1310_v48, %v776_v47 }
 0x225   :  { %v779_v52 = vadd.f32 %v778_v49, %v777_v51 }
 0x227   :  { %780 = vst [vmem:[#allocation17] sm:$0xff] %v779_v52  ;;  %v785_v53 = vpack.c.bf16 %v779_v52, %v779_v52 }
 0x229   :  { %1202 = vmatmul.mubr.bf16.vlgmr.msra.gmra.mxu0 %v785_v53 }
 0x2e9   :  { %v891_v56 = vpop.f32.mrf.mxu0 }
 0x2ea   :  { %v892_v57 = vadd.f32 %v1101_v55, %v891_v56 }
 0x2eb   :  { %v1203_v58 = vpop.f32.mrf.mxu0 }
 0x2ec   :  { %897 = vst [vmem:[#allocation16] sm:$0xff] %v892_v57  ;;  %899 = vmax.xlane.f32.xlu0 %v892_v57 }
 0x2ed   :  { %v894_v50 = vpop.f32.mrf.mxu0 }
 0x2ef   :  { %v1204_v59 = vpop.f32.mrf.mxu0 }
 0x375   :  { %v900_v61 = vpop.xlane.xlu0 %899 }
 0x376   :  { %v901_v62 = vmax.f32 %v898_v60, %v900_v61 }
 0x378   :  { %v903_v63 = vsub.f32 %v898_v60, %v901_v62  ;;  %920 = vst.msk [vmem:[#allocation4] sm:$0xff] %vm781_vm1, %v901_v62  ;;  %909 = vperm.xlu0 %1228, %v901_v62  }
 0x3f3   :  { %v910_v1 = vpop.permute.xlu0 %909 }
 0x3f4   :  { %v912_v0 = vsub.f32 %v892_v57, %v910_v1 }
 0x3f6   :  { %v913_v2 = vmul.f32 1.442695, %v912_v0 }
 0x3f8   :  { %1311 = vpow2.f32 %v913_v2 }
 0x405   :  { %v1312_v3 = vpop.eup %1311 }
 0x406   :  { %915 = vadd.xlane.f32.xlu1 %v1312_v3 }
 0x407   :  { %1592 = shalt.err (!%p1589_p6)
}
 0x408   :  { %939 = dma.vmem_to_hbm [thread:$0]  %s937_s16, 128, %s1949_s9, [#allocation10]  }
 0x409   :  { %s1601_s12 = scalar_lea.vmem %s947_s15, 128  ;;  %p1606_p8 = scmp.lt.s32.totalorder %s947_s15, %s947_s15 }
 0x40a   :  { %p1602_p7 = scmp.ne.s32.totalorder %s947_s15, %s1601_s12  ;;  %p1607_p9 = scmp.lt.s32.totalorder %s1601_s12, %s1601_s12 }
 0x40c   :  { %p1608_p10 = por %p1607_p9, %p1606_p8 }
 0x40e   :  { %p1609_p11 = pnand %p1608_p10, %p1602_p7 }
 0x410   :  { %1612 = shalt.err (!%p1609_p11)
}
 0x411   :  { %949 = dma.vmem_to_hbm [thread:$0]  %s947_s15, 128, %s1950_s10, [#allocation18]   ;;  %v904_v4 = vmul.f32 1.442695, %v903_v63  ;;  %v902_v6 = vld [vmem:[#allocation5] sm:$0xff]  ;;  %v924_v13 = vld [vmem:[#allocation4] sm:$0xff] }
 0x413   :  { %1313 = vpow2.f32 %v904_v4 }
 0x420   :  { %v1314_v5 = vpop.eup %1313 }
 0x421   :  { %v906_v7 = vmul.f32 %v1314_v5, %v902_v6 }
 0x48f   :  { %v916_v8 = vpop.xlane.xlu1 %915 }
 0x490   :  { %v917_v9 = vadd.f32 %v916_v8, %v906_v7 }
 0x492   :  { %919 = vst.msk [vmem:[#allocation5] sm:$0xff] %vm781_vm1, %v917_v9 }
 0x499   :  { %v925_v10 = vld [vmem:[#allocation5] sm:$0xff] }
 0x49a   :  { %1315 = vlog2.f32 %v925_v10 }
 0x4a7   :  { %v1316_v11 = vpop.eup %1315 }
 0x4a8   :  { %v927_v12 = vmul.f32 0.6931472, %v1316_v11 }
 0x4aa   :  { %v928_v14 = vadd.f32 %v927_v12, %v924_v13 }
 0x4ac   :  { %929 = vst.msk [vmem:[%s1951_s11] sm:$0xff] %vm781_vm1, %v928_v14 }
 0x4ad   :  { %1645 = dma.done.wait [#allocation10], 128  }
 0x4ae   :  { %1646 = vsyncadd [#allocation10], 4294967168 }
 0x4af   :  { %1647 = dma.done.wait [#allocation18], 128  }
 0x4b0   :  { %1648 = vsyncadd [#allocation18], 4294967168 }
 0x4b1   :  { %960 = vsyncpa [#allocation9], 1 }
 0x4b2   :  { %961 = vsyncpa [#allocation12], 1 }
 0x4b3   :  { %962 = vsyncpa [#allocation15], 1 }
 0x4b4   :  { %963 = vsyncpa [#allocation10], 1 }
 0x4b5   :  { %964 = vsyncpa [#allocation18], 1 }
 0x4b6   :  { %965 = vsyncmov [#allocation3] }
 0x4b9   :  { %s966_s10 = vpop.sfrf %965 }
 0x4ba   :  { %p1110_p12 = scmp.ne.s32.totalorder %s966_s10, 0 }
 0x4bc   :  { %970 = shalt.err (%p1110_p12)  }
 0x4bd   :  { %972 = vsyncmov [#allocation3 + $0x1] }
 0x4c0   :  { %s973_s20 = vpop.sfrf %972 }
 0x4c1   :  { %p1111_p13 = scmp.ne.s32.totalorder %s973_s20, 0 }
 0x4c3   :  { %977 = shalt.err (%p1111_p13)  }
 0x4c4   :  { %979 = vsyncmov [#allocation3 + $0x2] }
 0x4c7   :  { %s980_s26 = vpop.sfrf %979 }
 0x4c8   :  { %p1112_p0 = scmp.ne.s32.totalorder %s980_s26, 0 }
 0x4ca   :  { %984 = shalt.err (%p1112_p0)  }
 0x4cb   :  { %986 = vsyncmov [#allocation3 + $0x3] }
 0x4ce   :  { %s987_s11 = vpop.sfrf %986 }
 0x4cf   :  { %p1113_p1 = scmp.ne.s32.totalorder %s987_s11, 0 }
 0x4d1   :  { %991 = shalt.err (%p1113_p1)  }
 0x4d2   :  { %993 = vsyncmov [#allocation3 + $0x4] }
 0x4d5   :  { %s994_s17 = vpop.sfrf %993 }
 0x4d6   :  { %p1114_p2 = scmp.ne.s32.totalorder %s994_s17, 0 }
 0x4d8   :  { %998 = shalt.err (%p1114_p2)  }
 0x4d9   :  { %1000 = vsyncmov [#allocation3 + $0x5] }
 0x4dc   :  { %s1001_s21 = vpop.sfrf %1000 }
 0x4dd   :  { %p1115_p3 = scmp.ne.s32.totalorder %s1001_s21, 0 }
 0x4df   :  { %1005 = shalt.err (%p1115_p3)  }
 0x4e0   :  { %1007 = vsyncmov [#allocation3 + $0x6] }
 0x4e3   :  { %s1008_s22 = vpop.sfrf %1007 }
 0x4e4   :  { %p1116_p4 = scmp.ne.s32.totalorder %s1008_s22, 0 }
 0x4e6   :  { %1012 = shalt.err (%p1116_p4)  }
 0x4e7   :  { %1014 = vsyncmov [#allocation3 + $0x7] }
 0x4ea   :  { %s1015_s0 = vpop.sfrf %1014 }
 0x4eb   :  { %p1117_p5 = scmp.ne.s32.totalorder %s1015_s0, 0 }
 0x4ed   :  { %1019 = shalt.err (%p1117_p5)  }

</bundles_post_ra>
